<compile_context>
chip_gen: v7x
topology: tpu7x:2x2x1
jax: 0.10.0
libtpu: 0.0.40
codegen_flags: <defaults>
</compile_context>

<pallas_src>
import jax
import jax.numpy as jnp
from jax.experimental import pallas as pl
from jax.experimental.pallas import tpu as pltpu
import numpy as np

hidden_size = 32
input_size = 28
num_classes = 10
num_layers = 2  # hard-coded as two explicit LSTM layers in the kernel


def rnn_kernel(x_ref,    # (B*T, I)  f32, row index = b*T + t  (plain reshape of (B,T,I))
               w_ref,    # (160, 4H) bf16 weight slab:
                         #   rows   0: 32  W_ih_l0^T (rows I:32 zero padded)
                         #   rows  32: 64  W_hh_l0^T
                         #   rows  64:128  [W_ih_l1^T ; W_hh_l1^T]   (fused layer-1 weight)
                         #   rows 128:160  W_fc^T    (lanes C:4H zero padded)
               b_ref,    # (3, 4H)   f32 bias slab: [b_ih0+b_hh0 ; b_ih1+b_hh1 ; b_fc(padded)]
               out_ref): # (B, C)    f32
    B, C = out_ref.shape
    I = x_ref.shape[1]
    T = x_ref.shape[0] // B
    H4 = w_ref.shape[1]
    H = H4 // 4
    i_pad = ((I + 7) // 8) * 8            # 28 -> 32 (sublane-aligned slab offset)
    bf16 = jnp.bfloat16

    # ---- static slab views (zero runtime cost) ----
    wih0 = w_ref[0:I, :]                              # (I, 4H)  bf16
    whh0 = w_ref[i_pad:i_pad + H, :]                  # (H, 4H)  bf16
    w1 = w_ref[i_pad + H:i_pad + 3 * H, :]            # (2H, 4H) bf16  [W_ih_l1 ; W_hh_l1]
    wfc = w_ref[i_pad + 3 * H:i_pad + 4 * H, :]       # (H, 4H)  bf16, lanes C: are zero
    b0 = b_ref[0:1, :]
    b1 = b_ref[1:2, :]
    bfc = b_ref[2:3, :]

    # Single-tanh gate activation: sigmoid(x) = 0.5*tanh(0.5*x) + 0.5, so ONE
    # full-width EUP tanh activates the whole packed [i|f|g|o] preactivation;
    # lane-masked scale/shift pick sigmoid vs tanh per gate block (hoisted).
    lane = jax.lax.broadcasted_iota(jnp.int32, (1, H4), 1)
    is_g = (lane >= 2 * H) & (lane < 3 * H)
    scale = jnp.where(is_g, 1.0, 0.5).astype(jnp.float32)   # pre-scale == post-scale
    shift = jnp.where(is_g, 0.0, 0.5).astype(jnp.float32)

    def lstm_gates(pre, c):
        # pre: (B, 4H) f32 full preactivation (bias already folded in).
        act = jnp.tanh(pre * scale) * scale + shift           # [i|f|g|o] activated
        i = act[:, 0:H]
        f = act[:, H:2 * H]
        g = act[:, 2 * H:3 * H]
        o = act[:, 3 * H:4 * H]
        c_new = f * c + i * g
        h_new = o * jnp.tanh(c_new)
        return h_new, c_new

    # ---- layer-0 input projection hoisted off the recurrence (one matmul) ----
    xp0 = jnp.dot(x_ref[...].astype(bf16), wih0,
                  preferred_element_type=jnp.float32) + b0    # (B*T, 4H), b0 folded in
    xp0 = xp0.reshape(B, T, H4)                               # row b*T+t -> [b, t, :]

    # ---- wavefront-interleaved recurrence: T+1 waves instead of 2T serial cells.
    # Wave w runs layer-0 step w and layer-1 step w-1 (data-independent pair).
    zeros = jnp.zeros((B, H), jnp.float32)
    h0, c0, h1, c1 = zeros, zeros, zeros, zeros
    for w in range(T + 1):                 # fully unrolled: static & small
        nh0, nc0 = h0, c0
        if w < T:                          # layer-0 cell at timestep w
            pre0 = xp0[:, w, :]
            if w > 0:                      # h0 == 0 at w == 0: skip dead matmul
                pre0 = pre0 + jnp.dot(h0.astype(bf16), whh0,
                                      preferred_element_type=jnp.float32)
            nh0, nc0 = lstm_gates(pre0, c0)
        if w > 0:                          # layer-1 cell at timestep w-1
            h01 = jnp.concatenate([h0, h1], axis=1).astype(bf16)        # (B, 2H)
            pre1 = jnp.dot(h01, w1, preferred_element_type=jnp.float32) + b1
            h1, c1 = lstm_gates(pre1, c1)
        h0, c0 = nh0, nc0

    # ---- FC head on the last timestep's top-layer hidden state ----
    logits = jnp.dot(h1.astype(bf16), wfc,
                     preferred_element_type=jnp.float32) + bfc           # (B, 4H)
    out_ref[...] = logits[:, 0:C]


def make_params(key, input_size, hidden_size, num_classes):
    """Deterministic PyTorch-shaped parameters, repacked lane-dense (f32)."""
    k = 1.0 / np.sqrt(hidden_size)
    keys = jax.random.split(key, 10)

    def u(kk, shape):
        return jax.random.uniform(kk, shape, jnp.float32, minval=-k, maxval=k)

    # PyTorch nn.LSTM parameter shapes (gate order i, f, g, o along dim 0):
    w_ih_l0 = u(keys[0], (4 * hidden_size, input_size))
    w_hh_l0 = u(keys[1], (4 * hidden_size, hidden_size))
    b_ih_l0 = u(keys[2], (4 * hidden_size,))
    b_hh_l0 = u(keys[3], (4 * hidden_size,))
    w_ih_l1 = u(keys[4], (4 * hidden_size, hidden_size))
    w_hh_l1 = u(keys[5], (4 * hidden_size, hidden_size))
    b_ih_l1 = u(keys[6], (4 * hidden_size,))
    b_hh_l1 = u(keys[7], (4 * hidden_size,))
    # nn.Linear(hidden_size, num_classes)
    w_fc = u(keys[8], (num_classes, hidden_size))
    b_fc = u(keys[9], (num_classes,))

    # Packed, lane-dense layout: column blocks [i | f | g | o], width 4H = 128.
    params = dict(
        wih0=jnp.transpose(w_ih_l0),                           # (I, 4H)
        whh0=jnp.transpose(w_hh_l0),                           # (H, 4H)
        b0=(b_ih_l0 + b_hh_l0).reshape(1, 4 * hidden_size),    # (1, 4H)
        wih1=jnp.transpose(w_ih_l1),                           # (H, 4H)
        whh1=jnp.transpose(w_hh_l1),                           # (H, 4H)
        b1=(b_ih_l1 + b_hh_l1).reshape(1, 4 * hidden_size),    # (1, 4H)
        wfc=jnp.transpose(w_fc),                               # (H, C)
        bfc=b_fc.reshape(1, num_classes),                      # (1, C)
    )
    return params


def pack_params(params):
    """Consolidate all weights/biases into one bf16 slab + one f32 slab."""
    H, I, C = hidden_size, input_size, num_classes
    H4 = 4 * H
    i_pad = ((I + 7) // 8) * 8   # 32
    wih0_p = jnp.zeros((i_pad, H4), jnp.float32).at[0:I, :].set(params["wih0"])
    wfc_p = jnp.zeros((H, H4), jnp.float32).at[:, 0:C].set(params["wfc"])
    w_slab = jnp.concatenate(
        [wih0_p, params["whh0"], params["wih1"], params["whh1"], wfc_p],
        axis=0).astype(jnp.bfloat16)                                   # (160, 128)
    bfc_p = jnp.zeros((1, H4), jnp.float32).at[:, 0:C].set(params["bfc"])
    b_slab = jnp.concatenate([params["b0"], params["b1"], bfc_p], axis=0)  # (3, 128)
    return w_slab, b_slab


def rnn_forward(x, w_slab, b_slab):
    """x: (B, T, input_size) float32 (batch_first, like the PyTorch module)."""
    B, T, I = x.shape
    # Contiguous (free) reshape only — no wrapper transpose/convert launch.
    x_flat = x.reshape(B * T, I)
    vmem = pl.BlockSpec(memory_space=pltpu.MemorySpace.VMEM)
    return pl.pallas_call(
        rnn_kernel,
        out_shape=jax.ShapeDtypeStruct((B, num_classes), jnp.float32),
        in_specs=[vmem, vmem, vmem],
        out_specs=vmem,
    )(x_flat, w_slab, b_slab)


def rnn_reference(x, params):
    """Pure-JAX f32 reference replicating torch LSTM semantics."""
    B, T, _ = x.shape
    H = hidden_size

    def cell(x_t, h, c, wih, whh, b):
        pre = x_t @ wih + h @ whh + b
        i = jax.nn.sigmoid(pre[:, 0:H])
        f = jax.nn.sigmoid(pre[:, H:2 * H])
        g = jnp.tanh(pre[:, 2 * H:3 * H])
        o = jax.nn.sigmoid(pre[:, 3 * H:4 * H])
        c_new = f * c + i * g
        return o * jnp.tanh(c_new), c_new

    h0 = c0 = h1 = c1 = jnp.zeros((B, H), jnp.float32)
    for t in range(T):
        x_t = x[:, t, :]
        h0, c0 = cell(x_t, h0, c0, params["wih0"], params["whh0"], params["b0"])
        h1, c1 = cell(h0, h1, c1, params["wih1"], params["whh1"], params["b1"])
    return h1 @ params["wfc"] + params["bfc"]


if __name__ == "__main__":
    batch = 2
    seq = 8

    key = jax.random.PRNGKey(0)
    k_x, k_p = jax.random.split(key)
    x = jax.random.normal(k_x, (batch, seq, input_size), jnp.float32)
    params = make_params(k_p, input_size, hidden_size, num_classes)
    w_slab, b_slab = pack_params(params)

    out = jax.block_until_ready(rnn_forward(x, w_slab, b_slab))
    ref = jax.block_until_ready(rnn_reference(x, params))

    assert out.shape == (batch, num_classes)
    # bf16 MXU operands vs f32 reference -> looser tolerance than pure-f32 run.
    np.testing.assert_allclose(np.asarray(out), np.asarray(ref),
                               rtol=5e-2, atol=5e-2)
    print("KERNEL_OK")
</pallas_src>

<mosaic_0001>
module attributes {stable_mosaic.version = 11 : i64} {
  func.func @rnn_kernel(%arg0: memref<16x28xf32, #tpu.memory_space<vmem>>, %arg1: memref<160x128xbf16, #tpu.memory_space<vmem>>, %arg2: memref<3x128xf32, #tpu.memory_space<vmem>>, %arg3: memref<2x10xf32, #tpu.memory_space<vmem>>) attributes {dimension_semantics = [], scalar_prefetch = 0 : i64, scratch_operands = 0 : i64, tpu.core_type = #tpu.core_type<tc>} {
    %c0 = arith.constant 0 : index
    %c0_0 = arith.constant 0 : index
    %0 = vector.load %arg1[%c0, %c0_0] : memref<160x128xbf16, #tpu.memory_space<vmem>>, vector<28x128xbf16>
    %c32 = arith.constant 32 : index
    %c0_1 = arith.constant 0 : index
    %1 = vector.load %arg1[%c32, %c0_1] : memref<160x128xbf16, #tpu.memory_space<vmem>>, vector<32x128xbf16>
    %c64 = arith.constant 64 : index
    %c0_2 = arith.constant 0 : index
    %2 = vector.load %arg1[%c64, %c0_2] : memref<160x128xbf16, #tpu.memory_space<vmem>>, vector<64x128xbf16>
    %c128 = arith.constant 128 : index
    %c0_3 = arith.constant 0 : index
    %3 = vector.load %arg1[%c128, %c0_3] : memref<160x128xbf16, #tpu.memory_space<vmem>>, vector<32x128xbf16>
    %c0_4 = arith.constant 0 : index
    %c0_5 = arith.constant 0 : index
    %4 = vector.load %arg2[%c0_4, %c0_5] : memref<3x128xf32, #tpu.memory_space<vmem>>, vector<1x128xf32>
    %c1 = arith.constant 1 : index
    %c0_6 = arith.constant 0 : index
    %5 = vector.load %arg2[%c1, %c0_6] : memref<3x128xf32, #tpu.memory_space<vmem>>, vector<1x128xf32>
    %c2 = arith.constant 2 : index
    %c0_7 = arith.constant 0 : index
    %6 = vector.load %arg2[%c2, %c0_7] : memref<3x128xf32, #tpu.memory_space<vmem>>, vector<1x128xf32>
    %7 = tpu.iota {dimensions = array<i32: 1>} : vector<1x128xi32>
    %c64_i32 = arith.constant 64 : i32
    %8 = vector.broadcast %c64_i32 : i32 to vector<1x128xi32>
    %9 = arith.cmpi sge, %7, %8 : vector<1x128xi32>
    %c96_i32 = arith.constant 96 : i32
    %10 = vector.broadcast %c96_i32 : i32 to vector<1x128xi32>
    %11 = arith.cmpi slt, %7, %10 : vector<1x128xi32>
    %12 = arith.andi %9, %11 : vector<1x128xi1>
    %cst = arith.constant 1.000000e+00 : f32
    %cst_8 = arith.constant 5.000000e-01 : f32
    %13 = vector.broadcast %cst : f32 to vector<1x128xf32>
    %14 = vector.broadcast %cst_8 : f32 to vector<1x128xf32>
    %15 = arith.select %12, %13, %14 : vector<1x128xi1>, vector<1x128xf32>
    %cst_9 = arith.constant 0.000000e+00 : f32
    %cst_10 = arith.constant 5.000000e-01 : f32
    %16 = vector.broadcast %cst_9 : f32 to vector<1x128xf32>
    %17 = vector.broadcast %cst_10 : f32 to vector<1x128xf32>
    %18 = arith.select %12, %16, %17 : vector<1x128xi1>, vector<1x128xf32>
    %c0_11 = arith.constant 0 : index
    %c0_12 = arith.constant 0 : index
    %19 = vector.load %arg0[%c0_11, %c0_12] : memref<16x28xf32, #tpu.memory_space<vmem>>, vector<16x28xf32>
    %20 = arith.truncf %19 : vector<16x28xf32> to vector<16x28xbf16>
    %cst_13 = arith.constant dense<0.000000e+00> : vector<16x128xf32>
    %21 = tpu.matmul %20, %0, %cst_13 {dimension_numbers = #tpu.dot_dimension_numbers<[1], [0], [0], [1], [0, 0, 1, 1], [], []>} : vector<16x28xbf16>, vector<28x128xbf16>, vector<16x128xf32> -> vector<16x128xf32>
    %22 = vector.broadcast %4 : vector<1x128xf32> to vector<16x128xf32>
    %23 = arith.addf %21, %22 : vector<16x128xf32>
    %24 = vector.shape_cast %23 : vector<16x128xf32> to vector<2x8x128xf32>
    %cst_14 = arith.constant 0.000000e+00 : f32
    %25 = vector.broadcast %cst_14 : f32 to vector<2x32xf32>
    %26 = vector.extract_strided_slice %24 {offsets = [0, 0, 0], sizes = [2, 1, 128], strides = [1, 1, 1]} : vector<2x8x128xf32> to vector<2x1x128xf32>
    %27 = vector.shape_cast %26 : vector<2x1x128xf32> to vector<2x128xf32>
    %28 = vector.broadcast %15 : vector<1x128xf32> to vector<2x128xf32>
    %29 = arith.mulf %27, %28 : vector<2x128xf32>
    %30 = math.tanh %29 : vector<2x128xf32>
    %31 = vector.broadcast %15 : vector<1x128xf32> to vector<2x128xf32>
    %32 = arith.mulf %30, %31 : vector<2x128xf32>
    %33 = vector.broadcast %18 : vector<1x128xf32> to vector<2x128xf32>
    %34 = arith.addf %32, %33 : vector<2x128xf32>
    %35 = vector.extract_strided_slice %34 {offsets = [0, 0], sizes = [2, 32], strides = [1, 1]} : vector<2x128xf32> to vector<2x32xf32>
    %36 = vector.extract_strided_slice %34 {offsets = [0, 32], sizes = [2, 32], strides = [1, 1]} : vector<2x128xf32> to vector<2x32xf32>
    %37 = vector.extract_strided_slice %34 {offsets = [0, 64], sizes = [2, 32], strides = [1, 1]} : vector<2x128xf32> to vector<2x32xf32>
    %38 = vector.extract_strided_slice %34 {offsets = [0, 96], sizes = [2, 32], strides = [1, 1]} : vector<2x128xf32> to vector<2x32xf32>
    %39 = arith.mulf %36, %25 : vector<2x32xf32>
    %40 = arith.mulf %35, %37 : vector<2x32xf32>
    %41 = arith.addf %39, %40 : vector<2x32xf32>
    %42 = math.tanh %41 : vector<2x32xf32>
    %43 = arith.mulf %38, %42 : vector<2x32xf32>
    %44 = vector.extract_strided_slice %24 {offsets = [0, 1, 0], sizes = [2, 1, 128], strides = [1, 1, 1]} : vector<2x8x128xf32> to vector<2x1x128xf32>
    %45 = vector.shape_cast %44 : vector<2x1x128xf32> to vector<2x128xf32>
    %46 = arith.truncf %43 : vector<2x32xf32> to vector<2x32xbf16>
    %cst_15 = arith.constant dense<0.000000e+00> : vector<2x128xf32>
    %47 = tpu.matmul %46, %1, %cst_15 {dimension_numbers = #tpu.dot_dimension_numbers<[1], [0], [0], [1], [0, 0, 1, 1], [], []>} : vector<2x32xbf16>, vector<32x128xbf16>, vector<2x128xf32> -> vector<2x128xf32>
    %48 = arith.addf %45, %47 : vector<2x128xf32>
    %49 = vector.broadcast %15 : vector<1x128xf32> to vector<2x128xf32>
    %50 = arith.mulf %48, %49 : vector<2x128xf32>
    %51 = math.tanh %50 : vector<2x128xf32>
    %52 = vector.broadcast %15 : vector<1x128xf32> to vector<2x128xf32>
    %53 = arith.mulf %51, %52 : vector<2x128xf32>
    %54 = vector.broadcast %18 : vector<1x128xf32> to vector<2x128xf32>
    %55 = arith.addf %53, %54 : vector<2x128xf32>
    %56 = vector.extract_strided_slice %55 {offsets = [0, 0], sizes = [2, 32], strides = [1, 1]} : vector<2x128xf32> to vector<2x32xf32>
    %57 = vector.extract_strided_slice %55 {offsets = [0, 32], sizes = [2, 32], strides = [1, 1]} : vector<2x128xf32> to vector<2x32xf32>
    %58 = vector.extract_strided_slice %55 {offsets = [0, 64], sizes = [2, 32], strides = [1, 1]} : vector<2x128xf32> to vector<2x32xf32>
    %59 = vector.extract_strided_slice %55 {offsets = [0, 96], sizes = [2, 32], strides = [1, 1]} : vector<2x128xf32> to vector<2x32xf32>
    %60 = arith.mulf %57, %41 : vector<2x32xf32>
    %61 = arith.mulf %56, %58 : vector<2x32xf32>
    %62 = arith.addf %60, %61 : vector<2x32xf32>
    %63 = math.tanh %62 : vector<2x32xf32>
    %64 = arith.mulf %59, %63 : vector<2x32xf32>
    %65 = tpu.concatenate %43, %25 in 1 : vector<2x32xf32>, vector<2x32xf32> -> vector<2x64xf32>
    %66 = arith.truncf %65 : vector<2x64xf32> to vector<2x64xbf16>
    %cst_16 = arith.constant dense<0.000000e+00> : vector<2x128xf32>
    %67 = tpu.matmul %66, %2, %cst_16 {dimension_numbers = #tpu.dot_dimension_numbers<[1], [0], [0], [1], [0, 0, 1, 1], [], []>} : vector<2x64xbf16>, vector<64x128xbf16>, vector<2x128xf32> -> vector<2x128xf32>
    %68 = vector.broadcast %5 : vector<1x128xf32> to vector<2x128xf32>
    %69 = arith.addf %67, %68 : vector<2x128xf32>
    %70 = vector.broadcast %15 : vector<1x128xf32> to vector<2x128xf32>
    %71 = arith.mulf %69, %70 : vector<2x128xf32>
    %72 = math.tanh %71 : vector<2x128xf32>
    %73 = vector.broadcast %15 : vector<1x128xf32> to vector<2x128xf32>
    %74 = arith.mulf %72, %73 : vector<2x128xf32>
    %75 = vector.broadcast %18 : vector<1x128xf32> to vector<2x128xf32>
    %76 = arith.addf %74, %75 : vector<2x128xf32>
    %77 = vector.extract_strided_slice %76 {offsets = [0, 0], sizes = [2, 32], strides = [1, 1]} : vector<2x128xf32> to vector<2x32xf32>
    %78 = vector.extract_strided_slice %76 {offsets = [0, 32], sizes = [2, 32], strides = [1, 1]} : vector<2x128xf32> to vector<2x32xf32>
    %79 = vector.extract_strided_slice %76 {offsets = [0, 64], sizes = [2, 32], strides = [1, 1]} : vector<2x128xf32> to vector<2x32xf32>
    %80 = vector.extract_strided_slice %76 {offsets = [0, 96], sizes = [2, 32], strides = [1, 1]} : vector<2x128xf32> to vector<2x32xf32>
    %81 = arith.mulf %78, %25 : vector<2x32xf32>
    %82 = arith.mulf %77, %79 : vector<2x32xf32>
    %83 = arith.addf %81, %82 : vector<2x32xf32>
    %84 = math.tanh %83 : vector<2x32xf32>
    %85 = arith.mulf %80, %84 : vector<2x32xf32>
    %86 = vector.extract_strided_slice %24 {offsets = [0, 2, 0], sizes = [2, 1, 128], strides = [1, 1, 1]} : vector<2x8x128xf32> to vector<2x1x128xf32>
    %87 = vector.shape_cast %86 : vector<2x1x128xf32> to vector<2x128xf32>
    %88 = arith.truncf %64 : vector<2x32xf32> to vector<2x32xbf16>
    %cst_17 = arith.constant dense<0.000000e+00> : vector<2x128xf32>
    %89 = tpu.matmul %88, %1, %cst_17 {dimension_numbers = #tpu.dot_dimension_numbers<[1], [0], [0], [1], [0, 0, 1, 1], [], []>} : vector<2x32xbf16>, vector<32x128xbf16>, vector<2x128xf32> -> vector<2x128xf32>
    %90 = arith.addf %87, %89 : vector<2x128xf32>
    %91 = vector.broadcast %15 : vector<1x128xf32> to vector<2x128xf32>
    %92 = arith.mulf %90, %91 : vector<2x128xf32>
    %93 = math.tanh %92 : vector<2x128xf32>
    %94 = vector.broadcast %15 : vector<1x128xf32> to vector<2x128xf32>
    %95 = arith.mulf %93, %94 : vector<2x128xf32>
    %96 = vector.broadcast %18 : vector<1x128xf32> to vector<2x128xf32>
    %97 = arith.addf %95, %96 : vector<2x128xf32>
    %98 = vector.extract_strided_slice %97 {offsets = [0, 0], sizes = [2, 32], strides = [1, 1]} : vector<2x128xf32> to vector<2x32xf32>
    %99 = vector.extract_strided_slice %97 {offsets = [0, 32], sizes = [2, 32], strides = [1, 1]} : vector<2x128xf32> to vector<2x32xf32>
    %100 = vector.extract_strided_slice %97 {offsets = [0, 64], sizes = [2, 32], strides = [1, 1]} : vector<2x128xf32> to vector<2x32xf32>
    %101 = vector.extract_strided_slice %97 {offsets = [0, 96], sizes = [2, 32], strides = [1, 1]} : vector<2x128xf32> to vector<2x32xf32>
    %102 = arith.mulf %99, %62 : vector<2x32xf32>
    %103 = arith.mulf %98, %100 : vector<2x32xf32>
    %104 = arith.addf %102, %103 : vector<2x32xf32>
    %105 = math.tanh %104 : vector<2x32xf32>
    %106 = arith.mulf %101, %105 : vector<2x32xf32>
    %107 = tpu.concatenate %64, %85 in 1 : vector<2x32xf32>, vector<2x32xf32> -> vector<2x64xf32>
    %108 = arith.truncf %107 : vector<2x64xf32> to vector<2x64xbf16>
    %cst_18 = arith.constant dense<0.000000e+00> : vector<2x128xf32>
    %109 = tpu.matmul %108, %2, %cst_18 {dimension_numbers = #tpu.dot_dimension_numbers<[1], [0], [0], [1], [0, 0, 1, 1], [], []>} : vector<2x64xbf16>, vector<64x128xbf16>, vector<2x128xf32> -> vector<2x128xf32>
    %110 = vector.broadcast %5 : vector<1x128xf32> to vector<2x128xf32>
    %111 = arith.addf %109, %110 : vector<2x128xf32>
    %112 = vector.broadcast %15 : vector<1x128xf32> to vector<2x128xf32>
    %113 = arith.mulf %111, %112 : vector<2x128xf32>
    %114 = math.tanh %113 : vector<2x128xf32>
    %115 = vector.broadcast %15 : vector<1x128xf32> to vector<2x128xf32>
    %116 = arith.mulf %114, %115 : vector<2x128xf32>
    %117 = vector.broadcast %18 : vector<1x128xf32> to vector<2x128xf32>
    %118 = arith.addf %116, %117 : vector<2x128xf32>
    %119 = vector.extract_strided_slice %118 {offsets = [0, 0], sizes = [2, 32], strides = [1, 1]} : vector<2x128xf32> to vector<2x32xf32>
    %120 = vector.extract_strided_slice %118 {offsets = [0, 32], sizes = [2, 32], strides = [1, 1]} : vector<2x128xf32> to vector<2x32xf32>
    %121 = vector.extract_strided_slice %118 {offsets = [0, 64], sizes = [2, 32], strides = [1, 1]} : vector<2x128xf32> to vector<2x32xf32>
    %122 = vector.extract_strided_slice %118 {offsets = [0, 96], sizes = [2, 32], strides = [1, 1]} : vector<2x128xf32> to vector<2x32xf32>
    %123 = arith.mulf %120, %83 : vector<2x32xf32>
    %124 = arith.mulf %119, %121 : vector<2x32xf32>
    %125 = arith.addf %123, %124 : vector<2x32xf32>
    %126 = math.tanh %125 : vector<2x32xf32>
    %127 = arith.mulf %122, %126 : vector<2x32xf32>
    %128 = vector.extract_strided_slice %24 {offsets = [0, 3, 0], sizes = [2, 1, 128], strides = [1, 1, 1]} : vector<2x8x128xf32> to vector<2x1x128xf32>
    %129 = vector.shape_cast %128 : vector<2x1x128xf32> to vector<2x128xf32>
    %130 = arith.truncf %106 : vector<2x32xf32> to vector<2x32xbf16>
    %cst_19 = arith.constant dense<0.000000e+00> : vector<2x128xf32>
    %131 = tpu.matmul %130, %1, %cst_19 {dimension_numbers = #tpu.dot_dimension_numbers<[1], [0], [0], [1], [0, 0, 1, 1], [], []>} : vector<2x32xbf16>, vector<32x128xbf16>, vector<2x128xf32> -> vector<2x128xf32>
    %132 = arith.addf %129, %131 : vector<2x128xf32>
    %133 = vector.broadcast %15 : vector<1x128xf32> to vector<2x128xf32>
    %134 = arith.mulf %132, %133 : vector<2x128xf32>
    %135 = math.tanh %134 : vector<2x128xf32>
    %136 = vector.broadcast %15 : vector<1x128xf32> to vector<2x128xf32>
    %137 = arith.mulf %135, %136 : vector<2x128xf32>
    %138 = vector.broadcast %18 : vector<1x128xf32> to vector<2x128xf32>
    %139 = arith.addf %137, %138 : vector<2x128xf32>
    %140 = vector.extract_strided_slice %139 {offsets = [0, 0], sizes = [2, 32], strides = [1, 1]} : vector<2x128xf32> to vector<2x32xf32>
    %141 = vector.extract_strided_slice %139 {offsets = [0, 32], sizes = [2, 32], strides = [1, 1]} : vector<2x128xf32> to vector<2x32xf32>
    %142 = vector.extract_strided_slice %139 {offsets = [0, 64], sizes = [2, 32], strides = [1, 1]} : vector<2x128xf32> to vector<2x32xf32>
    %143 = vector.extract_strided_slice %139 {offsets = [0, 96], sizes = [2, 32], strides = [1, 1]} : vector<2x128xf32> to vector<2x32xf32>
    %144 = arith.mulf %141, %104 : vector<2x32xf32>
    %145 = arith.mulf %140, %142 : vector<2x32xf32>
    %146 = arith.addf %144, %145 : vector<2x32xf32>
    %147 = math.tanh %146 : vector<2x32xf32>
    %148 = arith.mulf %143, %147 : vector<2x32xf32>
    %149 = tpu.concatenate %106, %127 in 1 : vector<2x32xf32>, vector<2x32xf32> -> vector<2x64xf32>
    %150 = arith.truncf %149 : vector<2x64xf32> to vector<2x64xbf16>
    %cst_20 = arith.constant dense<0.000000e+00> : vector<2x128xf32>
    %151 = tpu.matmul %150, %2, %cst_20 {dimension_numbers = #tpu.dot_dimension_numbers<[1], [0], [0], [1], [0, 0, 1, 1], [], []>} : vector<2x64xbf16>, vector<64x128xbf16>, vector<2x128xf32> -> vector<2x128xf32>
    %152 = vector.broadcast %5 : vector<1x128xf32> to vector<2x128xf32>
    %153 = arith.addf %151, %152 : vector<2x128xf32>
    %154 = vector.broadcast %15 : vector<1x128xf32> to vector<2x128xf32>
    %155 = arith.mulf %153, %154 : vector<2x128xf32>
    %156 = math.tanh %155 : vector<2x128xf32>
    %157 = vector.broadcast %15 : vector<1x128xf32> to vector<2x128xf32>
    %158 = arith.mulf %156, %157 : vector<2x128xf32>
    %159 = vector.broadcast %18 : vector<1x128xf32> to vector<2x128xf32>
    %160 = arith.addf %158, %159 : vector<2x128xf32>
    %161 = vector.extract_strided_slice %160 {offsets = [0, 0], sizes = [2, 32], strides = [1, 1]} : vector<2x128xf32> to vector<2x32xf32>
    %162 = vector.extract_strided_slice %160 {offsets = [0, 32], sizes = [2, 32], strides = [1, 1]} : vector<2x128xf32> to vector<2x32xf32>
    %163 = vector.extract_strided_slice %160 {offsets = [0, 64], sizes = [2, 32], strides = [1, 1]} : vector<2x128xf32> to vector<2x32xf32>
    %164 = vector.extract_strided_slice %160 {offsets = [0, 96], sizes = [2, 32], strides = [1, 1]} : vector<2x128xf32> to vector<2x32xf32>
    %165 = arith.mulf %162, %125 : vector<2x32xf32>
    %166 = arith.mulf %161, %163 : vector<2x32xf32>
    %167 = arith.addf %165, %166 : vector<2x32xf32>
    %168 = math.tanh %167 : vector<2x32xf32>
    %169 = arith.mulf %164, %168 : vector<2x32xf32>
    %170 = vector.extract_strided_slice %24 {offsets = [0, 4, 0], sizes = [2, 1, 128], strides = [1, 1, 1]} : vector<2x8x128xf32> to vector<2x1x128xf32>
    %171 = vector.shape_cast %170 : vector<2x1x128xf32> to vector<2x128xf32>
    %172 = arith.truncf %148 : vector<2x32xf32> to vector<2x32xbf16>
    %cst_21 = arith.constant dense<0.000000e+00> : vector<2x128xf32>
    %173 = tpu.matmul %172, %1, %cst_21 {dimension_numbers = #tpu.dot_dimension_numbers<[1], [0], [0], [1], [0, 0, 1, 1], [], []>} : vector<2x32xbf16>, vector<32x128xbf16>, vector<2x128xf32> -> vector<2x128xf32>
    %174 = arith.addf %171, %173 : vector<2x128xf32>
    %175 = vector.broadcast %15 : vector<1x128xf32> to vector<2x128xf32>
    %176 = arith.mulf %174, %175 : vector<2x128xf32>
    %177 = math.tanh %176 : vector<2x128xf32>
    %178 = vector.broadcast %15 : vector<1x128xf32> to vector<2x128xf32>
    %179 = arith.mulf %177, %178 : vector<2x128xf32>
    %180 = vector.broadcast %18 : vector<1x128xf32> to vector<2x128xf32>
    %181 = arith.addf %179, %180 : vector<2x128xf32>
    %182 = vector.extract_strided_slice %181 {offsets = [0, 0], sizes = [2, 32], strides = [1, 1]} : vector<2x128xf32> to vector<2x32xf32>
    %183 = vector.extract_strided_slice %181 {offsets = [0, 32], sizes = [2, 32], strides = [1, 1]} : vector<2x128xf32> to vector<2x32xf32>
    %184 = vector.extract_strided_slice %181 {offsets = [0, 64], sizes = [2, 32], strides = [1, 1]} : vector<2x128xf32> to vector<2x32xf32>
    %185 = vector.extract_strided_slice %181 {offsets = [0, 96], sizes = [2, 32], strides = [1, 1]} : vector<2x128xf32> to vector<2x32xf32>
    %186 = arith.mulf %183, %146 : vector<2x32xf32>
    %187 = arith.mulf %182, %184 : vector<2x32xf32>
    %188 = arith.addf %186, %187 : vector<2x32xf32>
    %189 = math.tanh %188 : vector<2x32xf32>
    %190 = arith.mulf %185, %189 : vector<2x32xf32>
    %191 = tpu.concatenate %148, %169 in 1 : vector<2x32xf32>, vector<2x32xf32> -> vector<2x64xf32>
    %192 = arith.truncf %191 : vector<2x64xf32> to vector<2x64xbf16>
    %cst_22 = arith.constant dense<0.000000e+00> : vector<2x128xf32>
    %193 = tpu.matmul %192, %2, %cst_22 {dimension_numbers = #tpu.dot_dimension_numbers<[1], [0], [0], [1], [0, 0, 1, 1], [], []>} : vector<2x64xbf16>, vector<64x128xbf16>, vector<2x128xf32> -> vector<2x128xf32>
    %194 = vector.broadcast %5 : vector<1x128xf32> to vector<2x128xf32>
    %195 = arith.addf %193, %194 : vector<2x128xf32>
    %196 = vector.broadcast %15 : vector<1x128xf32> to vector<2x128xf32>
    %197 = arith.mulf %195, %196 : vector<2x128xf32>
    %198 = math.tanh %197 : vector<2x128xf32>
    %199 = vector.broadcast %15 : vector<1x128xf32> to vector<2x128xf32>
    %200 = arith.mulf %198, %199 : vector<2x128xf32>
    %201 = vector.broadcast %18 : vector<1x128xf32> to vector<2x128xf32>
    %202 = arith.addf %200, %201 : vector<2x128xf32>
    %203 = vector.extract_strided_slice %202 {offsets = [0, 0], sizes = [2, 32], strides = [1, 1]} : vector<2x128xf32> to vector<2x32xf32>
    %204 = vector.extract_strided_slice %202 {offsets = [0, 32], sizes = [2, 32], strides = [1, 1]} : vector<2x128xf32> to vector<2x32xf32>
    %205 = vector.extract_strided_slice %202 {offsets = [0, 64], sizes = [2, 32], strides = [1, 1]} : vector<2x128xf32> to vector<2x32xf32>
    %206 = vector.extract_strided_slice %202 {offsets = [0, 96], sizes = [2, 32], strides = [1, 1]} : vector<2x128xf32> to vector<2x32xf32>
    %207 = arith.mulf %204, %167 : vector<2x32xf32>
    %208 = arith.mulf %203, %205 : vector<2x32xf32>
    %209 = arith.addf %207, %208 : vector<2x32xf32>
    %210 = math.tanh %209 : vector<2x32xf32>
    %211 = arith.mulf %206, %210 : vector<2x32xf32>
    %212 = vector.extract_strided_slice %24 {offsets = [0, 5, 0], sizes = [2, 1, 128], strides = [1, 1, 1]} : vector<2x8x128xf32> to vector<2x1x128xf32>
    %213 = vector.shape_cast %212 : vector<2x1x128xf32> to vector<2x128xf32>
    %214 = arith.truncf %190 : vector<2x32xf32> to vector<2x32xbf16>
    %cst_23 = arith.constant dense<0.000000e+00> : vector<2x128xf32>
    %215 = tpu.matmul %214, %1, %cst_23 {dimension_numbers = #tpu.dot_dimension_numbers<[1], [0], [0], [1], [0, 0, 1, 1], [], []>} : vector<2x32xbf16>, vector<32x128xbf16>, vector<2x128xf32> -> vector<2x128xf32>
    %216 = arith.addf %213, %215 : vector<2x128xf32>
    %217 = vector.broadcast %15 : vector<1x128xf32> to vector<2x128xf32>
    %218 = arith.mulf %216, %217 : vector<2x128xf32>
    %219 = math.tanh %218 : vector<2x128xf32>
    %220 = vector.broadcast %15 : vector<1x128xf32> to vector<2x128xf32>
    %221 = arith.mulf %219, %220 : vector<2x128xf32>
    %222 = vector.broadcast %18 : vector<1x128xf32> to vector<2x128xf32>
    %223 = arith.addf %221, %222 : vector<2x128xf32>
    %224 = vector.extract_strided_slice %223 {offsets = [0, 0], sizes = [2, 32], strides = [1, 1]} : vector<2x128xf32> to vector<2x32xf32>
    %225 = vector.extract_strided_slice %223 {offsets = [0, 32], sizes = [2, 32], strides = [1, 1]} : vector<2x128xf32> to vector<2x32xf32>
    %226 = vector.extract_strided_slice %223 {offsets = [0, 64], sizes = [2, 32], strides = [1, 1]} : vector<2x128xf32> to vector<2x32xf32>
    %227 = vector.extract_strided_slice %223 {offsets = [0, 96], sizes = [2, 32], strides = [1, 1]} : vector<2x128xf32> to vector<2x32xf32>
    %228 = arith.mulf %225, %188 : vector<2x32xf32>
    %229 = arith.mulf %224, %226 : vector<2x32xf32>
    %230 = arith.addf %228, %229 : vector<2x32xf32>
    %231 = math.tanh %230 : vector<2x32xf32>
    %232 = arith.mulf %227, %231 : vector<2x32xf32>
    %233 = tpu.concatenate %190, %211 in 1 : vector<2x32xf32>, vector<2x32xf32> -> vector<2x64xf32>
    %234 = arith.truncf %233 : vector<2x64xf32> to vector<2x64xbf16>
    %cst_24 = arith.constant dense<0.000000e+00> : vector<2x128xf32>
    %235 = tpu.matmul %234, %2, %cst_24 {dimension_numbers = #tpu.dot_dimension_numbers<[1], [0], [0], [1], [0, 0, 1, 1], [], []>} : vector<2x64xbf16>, vector<64x128xbf16>, vector<2x128xf32> -> vector<2x128xf32>
    %236 = vector.broadcast %5 : vector<1x128xf32> to vector<2x128xf32>
    %237 = arith.addf %235, %236 : vector<2x128xf32>
    %238 = vector.broadcast %15 : vector<1x128xf32> to vector<2x128xf32>
    %239 = arith.mulf %237, %238 : vector<2x128xf32>
    %240 = math.tanh %239 : vector<2x128xf32>
    %241 = vector.broadcast %15 : vector<1x128xf32> to vector<2x128xf32>
    %242 = arith.mulf %240, %241 : vector<2x128xf32>
    %243 = vector.broadcast %18 : vector<1x128xf32> to vector<2x128xf32>
    %244 = arith.addf %242, %243 : vector<2x128xf32>
    %245 = vector.extract_strided_slice %244 {offsets = [0, 0], sizes = [2, 32], strides = [1, 1]} : vector<2x128xf32> to vector<2x32xf32>
    %246 = vector.extract_strided_slice %244 {offsets = [0, 32], sizes = [2, 32], strides = [1, 1]} : vector<2x128xf32> to vector<2x32xf32>
    %247 = vector.extract_strided_slice %244 {offsets = [0, 64], sizes = [2, 32], strides = [1, 1]} : vector<2x128xf32> to vector<2x32xf32>
    %248 = vector.extract_strided_slice %244 {offsets = [0, 96], sizes = [2, 32], strides = [1, 1]} : vector<2x128xf32> to vector<2x32xf32>
    %249 = arith.mulf %246, %209 : vector<2x32xf32>
    %250 = arith.mulf %245, %247 : vector<2x32xf32>
    %251 = arith.addf %249, %250 : vector<2x32xf32>
    %252 = math.tanh %251 : vector<2x32xf32>
    %253 = arith.mulf %248, %252 : vector<2x32xf32>
    %254 = vector.extract_strided_slice %24 {offsets = [0, 6, 0], sizes = [2, 1, 128], strides = [1, 1, 1]} : vector<2x8x128xf32> to vector<2x1x128xf32>
    %255 = vector.shape_cast %254 : vector<2x1x128xf32> to vector<2x128xf32>
    %256 = arith.truncf %232 : vector<2x32xf32> to vector<2x32xbf16>
    %cst_25 = arith.constant dense<0.000000e+00> : vector<2x128xf32>
    %257 = tpu.matmul %256, %1, %cst_25 {dimension_numbers = #tpu.dot_dimension_numbers<[1], [0], [0], [1], [0, 0, 1, 1], [], []>} : vector<2x32xbf16>, vector<32x128xbf16>, vector<2x128xf32> -> vector<2x128xf32>
    %258 = arith.addf %255, %257 : vector<2x128xf32>
    %259 = vector.broadcast %15 : vector<1x128xf32> to vector<2x128xf32>
    %260 = arith.mulf %258, %259 : vector<2x128xf32>
    %261 = math.tanh %260 : vector<2x128xf32>
    %262 = vector.broadcast %15 : vector<1x128xf32> to vector<2x128xf32>
    %263 = arith.mulf %261, %262 : vector<2x128xf32>
    %264 = vector.broadcast %18 : vector<1x128xf32> to vector<2x128xf32>
    %265 = arith.addf %263, %264 : vector<2x128xf32>
    %266 = vector.extract_strided_slice %265 {offsets = [0, 0], sizes = [2, 32], strides = [1, 1]} : vector<2x128xf32> to vector<2x32xf32>
    %267 = vector.extract_strided_slice %265 {offsets = [0, 32], sizes = [2, 32], strides = [1, 1]} : vector<2x128xf32> to vector<2x32xf32>
    %268 = vector.extract_strided_slice %265 {offsets = [0, 64], sizes = [2, 32], strides = [1, 1]} : vector<2x128xf32> to vector<2x32xf32>
    %269 = vector.extract_strided_slice %265 {offsets = [0, 96], sizes = [2, 32], strides = [1, 1]} : vector<2x128xf32> to vector<2x32xf32>
    %270 = arith.mulf %267, %230 : vector<2x32xf32>
    %271 = arith.mulf %266, %268 : vector<2x32xf32>
    %272 = arith.addf %270, %271 : vector<2x32xf32>
    %273 = math.tanh %272 : vector<2x32xf32>
    %274 = arith.mulf %269, %273 : vector<2x32xf32>
    %275 = tpu.concatenate %232, %253 in 1 : vector<2x32xf32>, vector<2x32xf32> -> vector<2x64xf32>
    %276 = arith.truncf %275 : vector<2x64xf32> to vector<2x64xbf16>
    %cst_26 = arith.constant dense<0.000000e+00> : vector<2x128xf32>
    %277 = tpu.matmul %276, %2, %cst_26 {dimension_numbers = #tpu.dot_dimension_numbers<[1], [0], [0], [1], [0, 0, 1, 1], [], []>} : vector<2x64xbf16>, vector<64x128xbf16>, vector<2x128xf32> -> vector<2x128xf32>
    %278 = vector.broadcast %5 : vector<1x128xf32> to vector<2x128xf32>
    %279 = arith.addf %277, %278 : vector<2x128xf32>
    %280 = vector.broadcast %15 : vector<1x128xf32> to vector<2x128xf32>
    %281 = arith.mulf %279, %280 : vector<2x128xf32>
    %282 = math.tanh %281 : vector<2x128xf32>
    %283 = vector.broadcast %15 : vector<1x128xf32> to vector<2x128xf32>
    %284 = arith.mulf %282, %283 : vector<2x128xf32>
    %285 = vector.broadcast %18 : vector<1x128xf32> to vector<2x128xf32>
    %286 = arith.addf %284, %285 : vector<2x128xf32>
    %287 = vector.extract_strided_slice %286 {offsets = [0, 0], sizes = [2, 32], strides = [1, 1]} : vector<2x128xf32> to vector<2x32xf32>
    %288 = vector.extract_strided_slice %286 {offsets = [0, 32], sizes = [2, 32], strides = [1, 1]} : vector<2x128xf32> to vector<2x32xf32>
    %289 = vector.extract_strided_slice %286 {offsets = [0, 64], sizes = [2, 32], strides = [1, 1]} : vector<2x128xf32> to vector<2x32xf32>
    %290 = vector.extract_strided_slice %286 {offsets = [0, 96], sizes = [2, 32], strides = [1, 1]} : vector<2x128xf32> to vector<2x32xf32>
    %291 = arith.mulf %288, %251 : vector<2x32xf32>
    %292 = arith.mulf %287, %289 : vector<2x32xf32>
    %293 = arith.addf %291, %292 : vector<2x32xf32>
    %294 = math.tanh %293 : vector<2x32xf32>
    %295 = arith.mulf %290, %294 : vector<2x32xf32>
    %296 = vector.extract_strided_slice %24 {offsets = [0, 7, 0], sizes = [2, 1, 128], strides = [1, 1, 1]} : vector<2x8x128xf32> to vector<2x1x128xf32>
    %297 = vector.shape_cast %296 : vector<2x1x128xf32> to vector<2x128xf32>
    %298 = arith.truncf %274 : vector<2x32xf32> to vector<2x32xbf16>
    %cst_27 = arith.constant dense<0.000000e+00> : vector<2x128xf32>
    %299 = tpu.matmul %298, %1, %cst_27 {dimension_numbers = #tpu.dot_dimension_numbers<[1], [0], [0], [1], [0, 0, 1, 1], [], []>} : vector<2x32xbf16>, vector<32x128xbf16>, vector<2x128xf32> -> vector<2x128xf32>
    %300 = arith.addf %297, %299 : vector<2x128xf32>
    %301 = vector.broadcast %15 : vector<1x128xf32> to vector<2x128xf32>
    %302 = arith.mulf %300, %301 : vector<2x128xf32>
    %303 = math.tanh %302 : vector<2x128xf32>
    %304 = vector.broadcast %15 : vector<1x128xf32> to vector<2x128xf32>
    %305 = arith.mulf %303, %304 : vector<2x128xf32>
    %306 = vector.broadcast %18 : vector<1x128xf32> to vector<2x128xf32>
    %307 = arith.addf %305, %306 : vector<2x128xf32>
    %308 = vector.extract_strided_slice %307 {offsets = [0, 0], sizes = [2, 32], strides = [1, 1]} : vector<2x128xf32> to vector<2x32xf32>
    %309 = vector.extract_strided_slice %307 {offsets = [0, 32], sizes = [2, 32], strides = [1, 1]} : vector<2x128xf32> to vector<2x32xf32>
    %310 = vector.extract_strided_slice %307 {offsets = [0, 64], sizes = [2, 32], strides = [1, 1]} : vector<2x128xf32> to vector<2x32xf32>
    %311 = vector.extract_strided_slice %307 {offsets = [0, 96], sizes = [2, 32], strides = [1, 1]} : vector<2x128xf32> to vector<2x32xf32>
    %312 = arith.mulf %309, %272 : vector<2x32xf32>
    %313 = arith.mulf %308, %310 : vector<2x32xf32>
    %314 = arith.addf %312, %313 : vector<2x32xf32>
    %315 = math.tanh %314 : vector<2x32xf32>
    %316 = arith.mulf %311, %315 : vector<2x32xf32>
    %317 = tpu.concatenate %274, %295 in 1 : vector<2x32xf32>, vector<2x32xf32> -> vector<2x64xf32>
    %318 = arith.truncf %317 : vector<2x64xf32> to vector<2x64xbf16>
    %cst_28 = arith.constant dense<0.000000e+00> : vector<2x128xf32>
    %319 = tpu.matmul %318, %2, %cst_28 {dimension_numbers = #tpu.dot_dimension_numbers<[1], [0], [0], [1], [0, 0, 1, 1], [], []>} : vector<2x64xbf16>, vector<64x128xbf16>, vector<2x128xf32> -> vector<2x128xf32>
    %320 = vector.broadcast %5 : vector<1x128xf32> to vector<2x128xf32>
    %321 = arith.addf %319, %320 : vector<2x128xf32>
    %322 = vector.broadcast %15 : vector<1x128xf32> to vector<2x128xf32>
    %323 = arith.mulf %321, %322 : vector<2x128xf32>
    %324 = math.tanh %323 : vector<2x128xf32>
    %325 = vector.broadcast %15 : vector<1x128xf32> to vector<2x128xf32>
    %326 = arith.mulf %324, %325 : vector<2x128xf32>
    %327 = vector.broadcast %18 : vector<1x128xf32> to vector<2x128xf32>
    %328 = arith.addf %326, %327 : vector<2x128xf32>
    %329 = vector.extract_strided_slice %328 {offsets = [0, 0], sizes = [2, 32], strides = [1, 1]} : vector<2x128xf32> to vector<2x32xf32>
    %330 = vector.extract_strided_slice %328 {offsets = [0, 32], sizes = [2, 32], strides = [1, 1]} : vector<2x128xf32> to vector<2x32xf32>
    %331 = vector.extract_strided_slice %328 {offsets = [0, 64], sizes = [2, 32], strides = [1, 1]} : vector<2x128xf32> to vector<2x32xf32>
    %332 = vector.extract_strided_slice %328 {offsets = [0, 96], sizes = [2, 32], strides = [1, 1]} : vector<2x128xf32> to vector<2x32xf32>
    %333 = arith.mulf %330, %293 : vector<2x32xf32>
    %334 = arith.mulf %329, %331 : vector<2x32xf32>
    %335 = arith.addf %333, %334 : vector<2x32xf32>
    %336 = math.tanh %335 : vector<2x32xf32>
    %337 = arith.mulf %332, %336 : vector<2x32xf32>
    %338 = tpu.concatenate %316, %337 in 1 : vector<2x32xf32>, vector<2x32xf32> -> vector<2x64xf32>
    %339 = arith.truncf %338 : vector<2x64xf32> to vector<2x64xbf16>
    %cst_29 = arith.constant dense<0.000000e+00> : vector<2x128xf32>
    %340 = tpu.matmul %339, %2, %cst_29 {dimension_numbers = #tpu.dot_dimension_numbers<[1], [0], [0], [1], [0, 0, 1, 1], [], []>} : vector<2x64xbf16>, vector<64x128xbf16>, vector<2x128xf32> -> vector<2x128xf32>
    %341 = vector.broadcast %5 : vector<1x128xf32> to vector<2x128xf32>
    %342 = arith.addf %340, %341 : vector<2x128xf32>
    %343 = vector.broadcast %15 : vector<1x128xf32> to vector<2x128xf32>
    %344 = arith.mulf %342, %343 : vector<2x128xf32>
    %345 = math.tanh %344 : vector<2x128xf32>
    %346 = vector.broadcast %15 : vector<1x128xf32> to vector<2x128xf32>
    %347 = arith.mulf %345, %346 : vector<2x128xf32>
    %348 = vector.broadcast %18 : vector<1x128xf32> to vector<2x128xf32>
    %349 = arith.addf %347, %348 : vector<2x128xf32>
    %350 = vector.extract_strided_slice %349 {offsets = [0, 0], sizes = [2, 32], strides = [1, 1]} : vector<2x128xf32> to vector<2x32xf32>
    %351 = vector.extract_strided_slice %349 {offsets = [0, 32], sizes = [2, 32], strides = [1, 1]} : vector<2x128xf32> to vector<2x32xf32>
    %352 = vector.extract_strided_slice %349 {offsets = [0, 64], sizes = [2, 32], strides = [1, 1]} : vector<2x128xf32> to vector<2x32xf32>
    %353 = vector.extract_strided_slice %349 {offsets = [0, 96], sizes = [2, 32], strides = [1, 1]} : vector<2x128xf32> to vector<2x32xf32>
    %354 = arith.mulf %351, %335 : vector<2x32xf32>
    %355 = arith.mulf %350, %352 : vector<2x32xf32>
    %356 = arith.addf %354, %355 : vector<2x32xf32>
    %357 = math.tanh %356 : vector<2x32xf32>
    %358 = arith.mulf %353, %357 : vector<2x32xf32>
    %359 = arith.truncf %358 : vector<2x32xf32> to vector<2x32xbf16>
    %cst_30 = arith.constant dense<0.000000e+00> : vector<2x128xf32>
    %360 = tpu.matmul %359, %3, %cst_30 {dimension_numbers = #tpu.dot_dimension_numbers<[1], [0], [0], [1], [0, 0, 1, 1], [], []>} : vector<2x32xbf16>, vector<32x128xbf16>, vector<2x128xf32> -> vector<2x128xf32>
    %361 = vector.broadcast %6 : vector<1x128xf32> to vector<2x128xf32>
    %362 = arith.addf %360, %361 : vector<2x128xf32>
    %363 = vector.extract_strided_slice %362 {offsets = [0, 0], sizes = [2, 10], strides = [1, 1]} : vector<2x128xf32> to vector<2x10xf32>
    %c0_31 = arith.constant 0 : index
    %c0_32 = arith.constant 0 : index
    %364 = vector.load %arg3[%c0_31, %c0_32] : memref<2x10xf32, #tpu.memory_space<vmem>>, vector<2x10xf32>
    tpu.vector_store %arg3[%c0_31, %c0_32], %363 {strides = array<i32>} : memref<2x10xf32, #tpu.memory_space<vmem>>, vector<2x10xf32>,
    return
  }
}

</mosaic_0001>

<bundles_post_ra>
// kernel: tpu_custom_call.1
= control target key start
LH: loop header
LB: loop body
LE: loop exit
PB: predicated region body
PF: predicated region fallthrough
CT: control target
= control target key end

     0   :  { %8 = vsyncpa [#allocation3], 0  ;;  %s2758_s0 = inlined_call_operand.hbm [shape: f32[16,28], index: 0, kind: input, shape index: {}]   ;;  %s2759_s1 = inlined_call_operand.hbm [shape: bf16[160,128], index: 1, kind: input, shape index: {}]   ;;  %s2760_s2 = inlined_call_operand.vmem [shape: f32[3,128], index: 2, kind: input, shape index: {}]   ;;  %s2761_s3 = inlined_call_operand.hbm [shape: f32[2,10], index: 3, kind: output, shape index: {}]  }
   0x1   :  { %9 = vsyncpa [#allocation6], 0 }
   0x2   :  { %10 = vsyncpa [#allocation4], 0  ;;  %s2203_s12 = smov [#allocation2]   ;;  %s2131_s16 = scalar_lea.hbm %s2758_s0, 256 }
   0x3   :  { %s16_s13 = sshll.u32 %s2203_s12, 4  ;;  %p2132_p0 = scmp.ne.s32.totalorder %s2758_s0, %s2131_s16  ;;  %s17_s13 = int_to_ptr.vmem [resolvable:$true] %s16_s13 }
   0x4   :  { %p2135_p1 = scmp.lt.u32.totalorder %s2131_s16, %s2758_s0 }
   0x6   :  { %p2137_p2 = pnand %p2135_p1, %p2132_p0 }
   0x8   :  { %2140 = shalt.err (!%p2137_p2)
}
   0x9   :  { %s2141_s21 = scalar_lea.vmem %s17_s13, 256  ;;  %p2146_p4 = scmp.lt.s32.totalorder %s17_s13, %s17_s13 }
   0xa   :  { %p2142_p3 = scmp.ne.s32.totalorder %s17_s13, %s2141_s21  ;;  %p2147_p5 = scmp.lt.s32.totalorder %s2141_s21, %s2141_s21 }
   0xc   :  { %p2148_p6 = por %p2147_p5, %p2146_p4 }
   0xe   :  { %p2149_p7 = pnand %p2148_p6, %p2142_p3 }
  0x10   :  { %2152 = shalt.err (!%p2149_p7)
}
  0x11   :  { %s2204_s22 = smov 128   ;;  %s2205_s23 = smov 8  }
  0x12   :  { %22 = dma.hbm_to_vmem [thread:$0]  %s2758_s0, 256, %s17_s13, [#allocation3], %s2204_s22, %s2204_s22, %s2205_s23  }
  0x13   :  { %s2206_s26 = smov [#allocation5]   ;;  %s2153_s30 = scalar_lea.hbm %s2759_s1, 1280 }
  0x14   :  { %s28_s27 = sshll.u32 %s2206_s26, 4  ;;  %p2154_p8 = scmp.ne.s32.totalorder %s2759_s1, %s2153_s30  ;;  %s29_s27 = int_to_ptr.vmem [resolvable:$true] %s28_s27 }
  0x15   :  { %p2157_p9 = scmp.lt.u32.totalorder %s2153_s30, %s2759_s1 }
  0x17   :  { %p2159_p10 = pnand %p2157_p9, %p2154_p8 }
  0x19   :  { %2162 = shalt.err (!%p2159_p10)
}
  0x1a   :  { %s2163_s8 = scalar_lea.vmem %s29_s27, 1280  ;;  %p2168_p12 = scmp.lt.s32.totalorder %s29_s27, %s29_s27 }
  0x1b   :  { %p2164_p11 = scmp.ne.s32.totalorder %s29_s27, %s2163_s8  ;;  %p2169_p13 = scmp.lt.s32.totalorder %s2163_s8, %s2163_s8 }
  0x1d   :  { %p2170_p0 = por %p2169_p13, %p2168_p12 }
  0x1f   :  { %p2171_p1 = pnand %p2170_p0, %p2164_p11 }
  0x21   :  { %2174 = shalt.err (!%p2171_p1)
}
  0x22   :  { %s2207_s0 = smov 64   ;;  %s2208_s9 = smov 4  }
  0x23   :  { %34 = dma.hbm_to_vmem [thread:$0]  %s2759_s1, 1280, %s29_s27, [#allocation6], %s2207_s0, %s2207_s0, %s2208_s9  }
  0x24   :  { %2197 = dma.done.wait [#allocation3], 256  }
  0x25   :  { %2198 = vsyncadd [#allocation3], 4294967040 }
  0x26   :  { %2199 = dma.done.wait [#allocation6], 1280  }
  0x27   :  { %2200 = vsyncadd [#allocation6], 4294966016  ;;  %v2209_v0 = vmov 0.0   ;;  %vm2210_vm0 = vmmov 0   ;;  %v2020_v1 = vld [vmem:[#allocation5] sm:$0xff]   ;;  %vm96_vm1 = vcmask 1045504   ;;  %v67_v7 = vlaneseq }
  0x28   :  { %1836 = vmatprep.subr.bf16.mxu0 %v2209_v0  ;;  %1840 = vmatprep.mubr.msk.bf16.mxu0 %vm2210_vm0, %v2209_v0  ;;  %v2021_v2 = vld [vmem:[#allocation5 + $0x8] sm:$0x3f]   ;;  %v74_v3 = vld [vmem:[#allocation2] sm:$0xff]  ;;  %v75_v4 = vld [vmem:[#allocation2 + $0x8] sm:$0xff]  ;;  %vm92_vm2 = vcmask 228352   ;;  %v2211_v12 = vmov 0.5  }
  0x29   :  { %1844 = vmatprep.subr.bf16.mxu1 %v2209_v0  ;;  %1848 = vmatprep.mubr.msk.bf16.mxu1 %vm2210_vm0, %v2209_v0  ;;  %v98_v5 = vsel %vm96_vm1, %v2021_v2, 0  ;;  %v76_v6 = vpack.c.bf16 %v75_v4, %v74_v3  ;;  %v68_v8 = vand.u32 127, %v67_v7  ;;  %v1739_v10 = vld [vmem:[%s2760_s2] ss:$0 sm:$0xff]  ;;  %s2212_s13 = smov 32   ;;  %v2308_v39 = vld [vmem:[#allocation5 + $0x20] sm:$0xff]  }
  0x2a   :  { %1837 = vmatpush3.bf16.msra.mxu0 %v2020_v1  ;;  %v2310_v40 = vld [vmem:[#allocation5 + $0x10] sm:$0xff]   ;;  %v2313_v41 = vld [vmem:[#allocation5 + $0x28] sm:$0xff]   ;;  %v2325_v44 = vld [vmem:[#allocation5 + $0x38] sm:$0xff]   ;;  %vm190_vm6 = vcmask 1041409   ;;  %vm207_vm7 = vcmask 261120   ;;  %vm342_vm8 = vcmask 523264  }
  0x2b   :  { %1838 = vmatprep.subr.bf16.mxu0 %v2209_v0  ;;  %vm69_vm3 = vcmp.ge.s32.totalorder %v68_v8, 64  ;;  %vm70_vm4 = vcmp.lt.s32.totalorder %v68_v8, 96  ;;  %1845 = vmatpush3.bf16.msra.mxu1 %v2310_v40  ;;  %v2320_v43 = vld [vmem:[#allocation5 + $0x30] sm:$0xff]   ;;  %v2328_v45 = vld [vmem:[#allocation5 + $0x18] sm:$0xff]   ;;  %vm519_vm9 = vcmask 1042434   ;;  %vm715_vm10 = vcmask 1043459  }
  0x2c   :  { %vm2270_vm5 = vmand %vm69_vm3, %vm70_vm4  ;;  %1846 = vmatprep.subr.bf16.mxu1 %v2209_v0  ;;  %v2355_v63 = vld [vmem:[%s2760_s2 + $0x1] ss:$0 sm:$0xff]  ;;  %vm906_vm11 = vcmask 1044484   ;;  %vm1103_vm12 = vcmask 1045509   ;;  %vm1294_vm13 = vcmask 1046534   ;;  %vm1491_vm14 = vcmask 1047559  }
  0x2d   :  { %v2279_v13 = vsel %vm2270_vm5, 1.0, %v2211_v12  ;;  %v2292_v24 = vsel %vm2270_vm5, 0.0, %v2211_v12  ;;  %s2213_s20 = smov [#allocation7]   ;;  %vm1721_vm15 = vcmask 74752  }
  0x2e   :  { %1839 = vmatpush3.bf16.msra.mxu0 %v98_v5  ;;  %s1729_s21 = sshll.u32 %s2213_s20, 4  ;;  %s1730_s21 = int_to_ptr.vmem [resolvable:$true] %s1729_s21 }
  0x2f   :  { %1852 = vmatprep.subr.bf16.mxu0 %v2209_v0  ;;  %1847 = vmatpush3.bf16.msra.mxu1 %v2328_v45  ;;  %s2175_s22 = scalar_lea.vmem %s1730_s21, 32  ;;  %p2180_p3 = scmp.lt.s32.totalorder %s1730_s21, %s1730_s21 }
  0x30   :  { %1864 = vmatprep.subr.bf16.mxu1 %v2209_v0  ;;  %p2176_p2 = scmp.ne.s32.totalorder %s1730_s21, %s2175_s22  ;;  %p2181_p4 = scmp.lt.s32.totalorder %s2175_s22, %s2175_s22 }
  0x31   :  { %1841 = vmatmul.mubr.msk.bf16.vlgmr.msra.gmra.mrb[0].mxu0 %vm92_vm2, %v76_v6 }
  0x32   :  { %1860 = vmatprep.mubr.msk.bf16.mxu0 %vm2210_vm0, %v2209_v0  ;;  %1853 = vmatpush3.bf16.msra.mxu0 %v2308_v39  ;;  %p2182_p5 = por %p2181_p4, %p2180_p3 }
  0x33   :  { %1854 = vmatprep.subr.bf16.mxu0 %v2209_v0 }
  0x34   :  { %p2183_p6 = pnand %p2182_p5, %p2176_p2 }
  0x36   :  { %1855 = vmatpush3.bf16.msra.mxu0 %v2313_v41 }
  0x37   :  { %1856 = vmatprep.subr.bf16.mxu0 %v2209_v0 }
  0x3a   :  { %1857 = vmatpush3.bf16.msra.mxu0 %v2320_v43 }
  0x3b   :  { %1858 = vmatprep.subr.bf16.mxu0 %v2209_v0 }
  0x3e   :  { %1859 = vmatpush3.bf16.msra.mxu0 %v2325_v44 }
  0x3f   :  { %1884 = vmatprep.subr.bf16.mxu0 %v2209_v0 }
 0x104   :  { %v134_v11 = vpop.f32.mrb[0].mxu0 }
 0x105   :  { %v2281_v14 = vadd.f32 %v1739_v10, %v134_v11  ;;  %v1842_v15 = vpop.f32.mrb[1].mxu0 }
 0x106   :  { %v137_v16 = vpop.f32.mrb[2].mxu0 }
 0x107   :  { %v2283_v17 = vadd.f32 %v1739_v10, %v137_v16  ;;  %v1843_v18 = vpop.f32.mrb[3].mxu0  ;;  %v141_v19 = vmul.f32 %v2281_v14, %v2279_v13 }
 0x109   :  { %v142_v20 = vmul.f32 %v2283_v17, %v2279_v13  ;;  %2030 = vtanh.f32 %v141_v19 }
 0x10b   :  { %2032 = vtanh.f32 %v142_v20 }
 0x113   :  { %v2031_v21 = vpop.eup %2030 }
 0x114   :  { %v145_v26 = vmul.f32 %v2031_v21, %v2279_v13 }
 0x115   :  { %v2033_v22 = vpop.eup %2032 }
 0x116   :  { %v146_v23 = vmul.f32 %v2033_v22, %v2279_v13  ;;  %v147_v27 = vadd.f32 %v145_v26, %v2292_v24 }
 0x118   :  { %v148_v25 = vadd.f32 %v146_v23, %v2292_v24  ;;  %v149_v35 = vmul.f32 0.0, %v147_v27 }
 0x11a   :  { %155 = vrot.lane.b32.xlu0 %v148_v25, %s2207_s0  ;;  %v150_v32 = vmul.f32 0.0, %v148_v25 }
 0x11e   :  { %153 = vrot.lane.b32.xlu0 %v147_v27, %s2207_s0 }
 0x18c   :  { %v156_v28 = vpop.permute.xlu0 %155 }
 0x18d   :  { %v160_v29 = vmul.f32 %v156_v28, %v148_v25 }
 0x18f   :  { %165 = vrot.lane.b32.xlu1 %v160_v29, %s2212_s13 }
 0x190   :  { %v154_v30 = vpop.permute.xlu0 %153 }
 0x191   :  { %v159_v31 = vmul.f32 %v154_v30, %v147_v27 }
 0x193   :  { %163 = vrot.lane.b32.xlu1 %v159_v31, %s2212_s13 }
 0x201   :  { %v166_v33 = vpop.permute.xlu1 %165 }
 0x202   :  { %v2301_v34 = vadd.f32 %v166_v33, %v150_v32 }
 0x204   :  { %2034 = vtanh.f32 %v2301_v34 }
 0x205   :  { %v164_v36 = vpop.permute.xlu1 %163 }
 0x206   :  { %v2304_v37 = vadd.f32 %v164_v36, %v149_v35  ;;  %v268_v36 = vrot.slane %v2301_v34, 7 }
 0x208   :  { %2036 = vtanh.f32 %v2304_v37 }
 0x20e   :  { %v2035_v38 = vpop.eup %2034 }
 0x20f   :  { %177 = vrot.lane.b32.xlu0 %v2035_v38, %s2207_s0  ;;  %v267_v38 = vrot.slane %v2304_v37, 7 }
 0x212   :  { %v2037_v42 = vpop.eup %2036 }
 0x213   :  { %175 = vrot.lane.b32.xlu1 %v2037_v42, %s2207_s0 }
 0x281   :  { %v178_v46 = vpop.permute.xlu0 %177 }
 0x282   :  { %v182_v47 = vmul.f32 %v178_v46, %v148_v25 }
 0x284   :  { %v184_v48 = vpack.c.bf16 %v182_v47, %v182_v47  ;;  %v307_v51 = vrot.slane %v182_v47, 7 }
 0x285   :  { %v176_v49 = vpop.permute.xlu1 %175 }
 0x286   :  { %v188_v50 = vunpack.c.l.b16 %v184_v48  ;;  %v181_v52 = vmul.f32 %v176_v49, %v147_v27 }
 0x288   :  { %v183_v53 = vpack.c.bf16 %v181_v52, %v181_v52  ;;  %v308_v54 = vsel %vm190_vm6, %v307_v51, %v181_v52  ;;  %v189_v55 = vrot.slane %v188_v50, 7 }
 0x289   :  { %309 = vrot.lane.b32.xlu1 %v308_v54, %s2212_s13 }
 0x28a   :  { %v187_v56 = vunpack.c.l.b16 %v183_v53 }
 0x28c   :  { %v191_v57 = vsel %vm190_vm6, %v189_v55, %v187_v56 }
 0x28d   :  { %v192_v58 = vpack.c.b16 %v191_v57, %v191_v57 }
 0x28f   :  { %193 = vrot.lane.b32.xlu0 %v192_v58, %s2212_s13 }
 0x2fb   :  { %v310_v59 = vpop.permute.xlu1 %309 }
 0x2fc   :  { %v312_v60 = vsel %vm207_vm7, %v310_v59, 0.0 }
 0x2fd   :  { %v313_v61 = vpack.c.bf16 %v312_v60, %v312_v60 }
 0x2ff   :  { %1861 = vmatmul.mubr.msk.bf16.vlgmr.msra.gmra.mrb[4].mxu0 %vm342_vm8, %v313_v61 }
 0x300   :  { %1885 = vmatpush3.bf16.msra.mxu0 %v2310_v40  ;;  %1888 = vmatprep.mubr.msk.bf16.mxu0 %vm2210_vm0, %v2209_v0 }
 0x301   :  { %v194_v62 = vpop.permute.xlu0 %193  ;;  %1886 = vmatprep.subr.bf16.mxu0 %v2209_v0 }
 0x302   :  { %1849 = vmatmul.mubr.msk.bf16.vlgmr.msra.gmra.mrb[0].mxu1 %vm207_vm7, %v194_v62 }
 0x303   :  { %1865 = vmatpush3.bf16.msra.mxu1 %v2310_v40  ;;  %1868 = vmatprep.mubr.msk.bf16.mxu1 %vm2210_vm0, %v2209_v0 }
 0x304   :  { %1866 = vmatprep.subr.bf16.mxu1 %v2209_v0  ;;  %1887 = vmatpush3.bf16.msra.mxu0 %v2328_v45 }
 0x305   :  { %1892 = vmatprep.subr.bf16.mxu0 %v2209_v0 }
 0x307   :  { %1867 = vmatpush3.bf16.msra.mxu1 %v2328_v45 }
 0x308   :  { %1872 = vmatprep.subr.bf16.mxu1 %v2209_v0 }
 0x3d2   :  { %v380_v1 = vpop.f32.mrb[4].mxu0 }
 0x3d3   :  { %v381_v2 = vadd.f32 %v2355_v63, %v380_v1  ;;  %v1862_v3 = vpop.f32.mrb[5].mxu0 }
 0x3d4   :  { %v383_v4 = vpop.f32.mrb[6].mxu0 }
 0x3d5   :  { %v245_v5 = vpop.f32.mrb[0].mxu1  ;;  %v1863_v6 = vpop.f32.mrb[7].mxu0  ;;  %v386_v10 = vmul.f32 %v381_v2, %v2279_v13 }
 0x3d6   :  { %v252_v7 = vrot.slane %v245_v5, 7  ;;  %v256_v8 = vadd.f32 %v245_v5, %v2283_v17  ;;  %v1850_v9 = vpop.f32.mrb[1].mxu1 }
 0x3d7   :  { %v248_v11 = vpop.f32.mrb[2].mxu1 }
 0x3d8   :  { %v255_v12 = vadd.f32 %v252_v7, %v2281_v14  ;;  %v258_v15 = vmul.f32 %v256_v8, %v2279_v13  ;;  %v1851_v16 = vpop.f32.mrb[3].mxu1 }
 0x3da   :  { %v257_v18 = vmul.f32 %v255_v12, %v2279_v13  ;;  %2038 = vtanh.f32 %v258_v15 }
 0x3db   :  { %2040 = vtanh.f32 %v386_v10 }
 0x3dc   :  { %2042 = vtanh.f32 %v257_v18 }
 0x3e4   :  { %v2039_v19 = vpop.eup %2038 }
 0x3e5   :  { %v2041_v20 = vpop.eup %2040  ;;  %v262_v21 = vmul.f32 %v2039_v19, %v2279_v13 }
 0x3e6   :  { %v2043_v22 = vpop.eup %2042  ;;  %v388_v27 = vmul.f32 %v2041_v20, %v2279_v13 }
 0x3e7   :  { %v264_v23 = vadd.f32 %v262_v21, %v2292_v24  ;;  %v261_v25 = vmul.f32 %v2043_v22, %v2279_v13 }
 0x3e8   :  { %v389_v28 = vadd.f32 %v388_v27, %v2292_v24 }
 0x3e9   :  { %277 = vrot.lane.b32.xlu1 %v264_v23, %s2207_s0  ;;  %v263_v26 = vadd.f32 %v261_v25, %v2292_v24  ;;  %v272_v42 = vmul.f32 %v268_v36, %v264_v23 }
 0x3ea   :  { %v390_v51 = vmul.f32 0.0, %v389_v28 }
 0x3eb   :  { %275 = vrot.lane.b32.xlu0 %v263_v26, %s2207_s0  ;;  %v271_v48 = vmul.f32 %v267_v38, %v263_v26 }
 0x3ef   :  { %392 = vrot.lane.b32.xlu0 %v389_v28, %s2207_s0 }
 0x45b   :  { %v278_v29 = vpop.permute.xlu1 %277 }
 0x45c   :  { %v282_v30 = vmul.f32 %v278_v29, %v264_v23 }
 0x45d   :  { %v276_v31 = vpop.permute.xlu0 %275 }
 0x45e   :  { %v281_v32 = vmul.f32 %v276_v31, %v263_v26  ;;  %287 = vrot.lane.b32.xlu0 %v282_v30, %s2212_s13 }
 0x460   :  { %285 = vrot.lane.b32.xlu1 %v281_v32, %s2212_s13 }
 0x461   :  { %v393_v33 = vpop.permute.xlu0 %392 }
 0x462   :  { %v395_v35 = vmul.f32 %v393_v33, %v389_v28 }
 0x464   :  { %397 = vrot.lane.b32.xlu1 %v395_v35, %s2212_s13 }
 0x4d0   :  { %v288_v46 = vpop.permute.xlu0 %287 }
 0x4d1   :  { %v2377_v47 = vadd.f32 %v288_v46, %v272_v42 }
 0x4d2   :  { %v286_v49 = vpop.permute.xlu1 %285 }
 0x4d3   :  { %2044 = vtanh.f32 %v2377_v47  ;;  %v2380_v50 = vadd.f32 %v286_v49, %v271_v48 }
 0x4d5   :  { %2046 = vtanh.f32 %v2380_v50 }
 0x4d6   :  { %v398_v52 = vpop.permute.xlu1 %397 }
 0x4d7   :  { %v2383_v53 = vadd.f32 %v398_v52, %v390_v51 }
 0x4d9   :  { %2048 = vtanh.f32 %v2383_v53 }
 0x4dd   :  { %v2045_v34 = vpop.eup %2044 }
 0x4de   :  { %299 = vrot.lane.b32.xlu1 %v2045_v34, %s2207_s0 }
 0x4df   :  { %v2047_v37 = vpop.eup %2046 }
 0x4e0   :  { %297 = vrot.lane.b32.xlu0 %v2047_v37, %s2207_s0 }
 0x4e3   :  { %v2049_v54 = vpop.eup %2048 }
 0x4e4   :  { %403 = vrot.lane.b32.xlu0 %v2049_v54, %s2207_s0 }
 0x550   :  { %v300_v55 = vpop.permute.xlu1 %299 }
 0x551   :  { %v304_v56 = vmul.f32 %v300_v55, %v264_v23 }
 0x552   :  { %v298_v57 = vpop.permute.xlu0 %297 }
 0x553   :  { %v518_v58 = vrot.slane %v304_v56, 7  ;;  %v303_v59 = vmul.f32 %v298_v57, %v263_v26  ;;  %v408_v60 = vpack.c.bf16 %v304_v56, %v304_v56 }
 0x555   :  { %v407_v61 = vpack.c.bf16 %v303_v59, %v303_v59  ;;  %v520_v62 = vsel %vm519_vm9, %v518_v58, %v303_v59  ;;  %v412_v2 = vunpack.c.l.b16 %v408_v60 }
 0x556   :  { %521 = vrot.lane.b32.xlu0 %v520_v62, %s2212_s13  ;;  %v404_v4 = vpop.permute.xlu0 %403  ;;  %v478_v62 = vrot.slane %v2380_v50, 7 }
 0x557   :  { %v411_v1 = vunpack.c.l.b16 %v407_v61  ;;  %v406_v6 = vmul.f32 %v404_v4, %v389_v28 }
 0x559   :  { %v413_v3 = vrot.slane %v411_v1, 1  ;;  %v525_v8 = vrot.slane %v406_v6, 7  ;;  %v479_v1 = vrot.slane %v2377_v47, 7 }
 0x55b   :  { %v414_v5 = vsel %vm190_vm6, %v412_v2, %v413_v3 }
 0x55c   :  { %v415_v7 = vpack.c.b16 %v414_v5, %v414_v5 }
 0x55e   :  { %416 = vrot.lane.b32.xlu1 %v415_v7, %s2212_s13 }
 0x562   :  { %526 = vrot.lane.b32.xlu1 %v525_v8, %s2207_s0 }
 0x5c8   :  { %v522_v10 = vpop.permute.xlu0 %521 }
 0x5d0   :  { %v417_v9 = vpop.permute.xlu1 %416 }
 0x5d1   :  { %1869 = vmatmul.mubr.msk.bf16.vlgmr.msra.gmra.mrb[4].mxu1 %vm207_vm7, %v417_v9 }
 0x5d2   :  { %1873 = vmatpush3.bf16.msra.mxu1 %v2308_v39  ;;  %1880 = vmatprep.mubr.msk.bf16.mxu1 %vm2210_vm0, %v2209_v0 }
 0x5d3   :  { %1874 = vmatprep.subr.bf16.mxu1 %v2209_v0 }
 0x5d4   :  { %v527_v11 = vpop.permute.xlu1 %526 }
 0x5d5   :  { %v529_v12 = vsel %vm207_vm7, %v522_v10, %v527_v11 }
 0x5d6   :  { %v530_v15 = vpack.c.bf16 %v529_v12, %v529_v12  ;;  %1875 = vmatpush3.bf16.msra.mxu1 %v2313_v41 }
 0x5d7   :  { %1876 = vmatprep.subr.bf16.mxu1 %v2209_v0 }
 0x5d8   :  { %v534_v16 = vshll.u32 %v530_v15, 16  ;;  %v532_v19 = vshrl.u32 %v530_v15, 16 }
 0x5da   :  { %1877 = vmatpush3.bf16.msra.mxu1 %v2320_v43  ;;  %v536_v18 = vrot.slane %v534_v16, 1 }
 0x5db   :  { %1878 = vmatprep.subr.bf16.mxu1 %v2209_v0 }
 0x5dc   :  { %v537_v20 = vor.u32 %v536_v18, %v532_v19 }
 0x5de   :  { %1879 = vmatpush3.bf16.msra.mxu1 %v2325_v44 }
 0x5df   :  { %1904 = vmatprep.subr.bf16.mxu1 %v2209_v0 }
 0x5e1   :  { %1881 = vmatmul.mubr.msk.bf16.vlgmr.msra.gmra.mrb[8].mxu1 %vm342_vm8, %v537_v20 }
 0x5e2   :  { %1905 = vmatpush3.bf16.msra.mxu1 %v2310_v40  ;;  %1908 = vmatprep.mubr.msk.bf16.mxu1 %vm2210_vm0, %v2209_v0 }
 0x5e3   :  { %1906 = vmatprep.subr.bf16.mxu1 %v2209_v0 }
 0x5e6   :  { %1907 = vmatpush3.bf16.msra.mxu1 %v2328_v45 }
 0x5e7   :  { %1912 = vmatprep.subr.bf16.mxu1 %v2209_v0 }
 0x6a4   :  { %v455_v21 = vpop.f32.mrb[4].mxu1 }
 0x6a5   :  { %v462_v22 = vrot.slane %v455_v21, 6  ;;  %v463_v23 = vrot.slane %v455_v21, 7  ;;  %v1870_v25 = vpop.f32.mrb[5].mxu1 }
 0x6a6   :  { %v458_v26 = vpop.f32.mrb[6].mxu1 }
 0x6a7   :  { %v466_v27 = vadd.f32 %v462_v22, %v2281_v14  ;;  %v467_v28 = vadd.f32 %v463_v23, %v2283_v17  ;;  %v1871_v29 = vpop.f32.mrb[7].mxu1 }
 0x6a9   :  { %v468_v30 = vmul.f32 %v466_v27, %v2279_v13  ;;  %v469_v31 = vmul.f32 %v467_v28, %v2279_v13 }
 0x6ab   :  { %2050 = vtanh.f32 %v468_v30 }
 0x6ac   :  { %2052 = vtanh.f32 %v469_v31 }
 0x6b4   :  { %v575_v32 = vpop.f32.mrb[8].mxu1 }
 0x6b5   :  { %v2051_v33 = vpop.eup %2050  ;;  %v576_v35 = vadd.f32 %v2355_v63, %v575_v32  ;;  %v1882_v36 = vpop.f32.mrb[9].mxu1 }
 0x6b6   :  { %v2053_v38 = vpop.eup %2052  ;;  %v578_v42 = vpop.f32.mrb[10].mxu1  ;;  %v472_v46 = vmul.f32 %v2051_v33, %v2279_v13 }
 0x6b7   :  { %v581_v48 = vmul.f32 %v576_v35, %v2279_v13  ;;  %v1883_v49 = vpop.f32.mrb[11].mxu1  ;;  %v473_v51 = vmul.f32 %v2053_v38, %v2279_v13 }
 0x6b8   :  { %v474_v52 = vadd.f32 %v472_v46, %v2292_v24 }
 0x6b9   :  { %2054 = vtanh.f32 %v581_v48  ;;  %v475_v34 = vadd.f32 %v473_v51, %v2292_v24 }
 0x6ba   :  { %486 = vrot.lane.b32.xlu0 %v474_v52, %s2207_s0  ;;  %v482_v2 = vmul.f32 %v478_v62, %v474_v52 }
 0x6bb   :  { %488 = vrot.lane.b32.xlu1 %v475_v34, %s2207_s0  ;;  %v483_v4 = vmul.f32 %v479_v1, %v475_v34 }
 0x6c3   :  { %v2055_v37 = vpop.eup %2054 }
 0x6c4   :  { %v583_v54 = vmul.f32 %v2055_v37, %v2279_v13 }
 0x6c6   :  { %v584_v55 = vadd.f32 %v583_v54, %v2292_v24 }
 0x6c8   :  { %587 = vrot.lane.b32.xlu0 %v584_v55, %s2207_s0  ;;  %v585_v9 = vmul.f32 %v584_v55, %v2383_v53 }
 0x72c   :  { %v487_v56 = vpop.permute.xlu0 %486 }
 0x72d   :  { %v489_v57 = vpop.permute.xlu1 %488  ;;  %v492_v58 = vmul.f32 %v487_v56, %v474_v52 }
 0x72e   :  { %v493_v59 = vmul.f32 %v489_v57, %v475_v34 }
 0x72f   :  { %496 = vrot.lane.b32.xlu1 %v492_v58, %s2212_s13 }
 0x730   :  { %498 = vrot.lane.b32.xlu0 %v493_v59, %s2212_s13 }
 0x73a   :  { %v588_v60 = vpop.permute.xlu0 %587 }
 0x73b   :  { %v590_v61 = vmul.f32 %v588_v60, %v584_v55 }
 0x73d   :  { %592 = vrot.lane.b32.xlu1 %v590_v61, %s2212_s13 }
 0x7a1   :  { %v497_v3 = vpop.permute.xlu1 %496 }
 0x7a2   :  { %v2432_v5 = vadd.f32 %v497_v3, %v482_v2  ;;  %v499_v6 = vpop.permute.xlu0 %498 }
 0x7a3   :  { %v2434_v7 = vadd.f32 %v499_v6, %v483_v4 }
 0x7a4   :  { %2056 = vtanh.f32 %v2432_v5 }
 0x7a5   :  { %2058 = vtanh.f32 %v2434_v7 }
 0x7ae   :  { %v2057_v8 = vpop.eup %2056 }
 0x7af   :  { %v2059_v10 = vpop.eup %2058  ;;  %v593_v11 = vpop.permute.xlu1 %592  ;;  %508 = vrot.lane.b32.xlu0 %v2057_v8, %s2207_s0 }
 0x7b0   :  { %v2440_v47 = vadd.f32 %v593_v11, %v585_v9  ;;  %510 = vrot.lane.b32.xlu1 %v2059_v10, %s2207_s0 }
 0x7b2   :  { %2060 = vtanh.f32 %v2440_v47 }
 0x7bc   :  { %v2061_v50 = vpop.eup %2060 }
 0x7bd   :  { %598 = vrot.lane.b32.xlu0 %v2061_v50, %s2207_s0 }
 0x821   :  { %v509_v12 = vpop.permute.xlu0 %508 }
 0x822   :  { %v511_v15 = vpop.permute.xlu1 %510  ;;  %v514_v16 = vmul.f32 %v509_v12, %v474_v52 }
 0x823   :  { %v515_v18 = vmul.f32 %v511_v15, %v475_v34 }
 0x824   :  { %v602_v19 = vpack.c.bf16 %v514_v16, %v514_v16 }
 0x825   :  { %v603_v53 = vpack.c.bf16 %v515_v18, %v515_v18  ;;  %v714_v20 = vrot.slane %v515_v18, 7 }
 0x826   :  { %v606_v21 = vunpack.c.l.b16 %v602_v19 }
 0x827   :  { %v607_v22 = vunpack.c.l.b16 %v603_v53  ;;  %v716_v23 = vsel %vm715_vm10, %v714_v20, %v514_v16  ;;  %v674_v53 = vrot.slane %v2432_v5, 7  ;;  %v675_v20 = vrot.slane %v2434_v7, 7 }
 0x828   :  { %v608_v25 = vrot.slane %v606_v21, 2  ;;  %717 = vrot.lane.b32.xlu0 %v716_v23, %s2212_s13 }
 0x829   :  { %v609_v26 = vrot.slane %v607_v22, 1 }
 0x82b   :  { %v610_v27 = vsel %vm190_vm6, %v609_v26, %v608_v25 }
 0x82c   :  { %v611_v28 = vpack.c.b16 %v610_v27, %v610_v27 }
 0x82e   :  { %612 = vrot.lane.b32.xlu1 %v611_v28, %s2212_s13 }
 0x82f   :  { %v599_v29 = vpop.permute.xlu0 %598 }
 0x830   :  { %v601_v30 = vmul.f32 %v599_v29, %v584_v55 }
 0x832   :  { %v721_v31 = vrot.slane %v601_v30, 6 }
 0x834   :  { %722 = vrot.lane.b32.xlu1 %v721_v31, %s2207_s0 }
 0x89a   :  { %v718_v35 = vpop.permute.xlu0 %717 }
 0x8a0   :  { %v613_v32 = vpop.permute.xlu1 %612 }
 0x8a1   :  { %1889 = vmatmul.mubr.msk.bf16.vlgmr.msra.gmra.mrb[8].mxu0 %vm207_vm7, %v613_v32 }
 0x8a2   :  { %1893 = vmatpush3.bf16.msra.mxu0 %v2308_v39  ;;  %1900 = vmatprep.mubr.msk.bf16.mxu0 %vm2210_vm0, %v2209_v0 }
 0x8a3   :  { %1894 = vmatprep.subr.bf16.mxu0 %v2209_v0 }
 0x8a6   :  { %1895 = vmatpush3.bf16.msra.mxu0 %v2313_v41  ;;  %v723_v33 = vpop.permute.xlu1 %722 }
 0x8a7   :  { %1896 = vmatprep.subr.bf16.mxu0 %v2209_v0  ;;  %v725_v36 = vsel %vm207_vm7, %v718_v35, %v723_v33 }
 0x8a8   :  { %v726_v38 = vpack.c.bf16 %v725_v36, %v725_v36 }
 0x8aa   :  { %1897 = vmatpush3.bf16.msra.mxu0 %v2320_v43  ;;  %v728_v42 = vrot.slane %v726_v38, 1 }
 0x8ab   :  { %1898 = vmatprep.subr.bf16.mxu0 %v2209_v0 }
 0x8ae   :  { %1899 = vmatpush3.bf16.msra.mxu0 %v2325_v44 }
 0x8af   :  { %1924 = vmatprep.subr.bf16.mxu0 %v2209_v0 }
 0x8b1   :  { %1901 = vmatmul.mubr.msk.bf16.vlgmr.msra.gmra.mrb[12].mxu0 %vm342_vm8, %v728_v42 }
 0x8b2   :  { %1925 = vmatpush3.bf16.msra.mxu0 %v2310_v40  ;;  %1928 = vmatprep.mubr.msk.bf16.mxu0 %vm2210_vm0, %v2209_v0 }
 0x8b3   :  { %1926 = vmatprep.subr.bf16.mxu0 %v2209_v0 }
 0x8b6   :  { %1927 = vmatpush3.bf16.msra.mxu0 %v2328_v45 }
 0x8b7   :  { %1932 = vmatprep.subr.bf16.mxu0 %v2209_v0 }
 0x974   :  { %v651_v46 = vpop.f32.mrb[8].mxu0 }
 0x975   :  { %v658_v48 = vrot.slane %v651_v46, 5  ;;  %v659_v49 = vrot.slane %v651_v46, 6  ;;  %v1890_v51 = vpop.f32.mrb[9].mxu0 }
 0x976   :  { %v654_v52 = vpop.f32.mrb[10].mxu0 }
 0x977   :  { %v662_v34 = vadd.f32 %v658_v48, %v2281_v14  ;;  %v663_v37 = vadd.f32 %v659_v49, %v2283_v17  ;;  %v1891_v54 = vpop.f32.mrb[11].mxu0 }
 0x979   :  { %v664_v55 = vmul.f32 %v662_v34, %v2279_v13  ;;  %v665_v56 = vmul.f32 %v663_v37, %v2279_v13 }
 0x97b   :  { %2062 = vtanh.f32 %v664_v55 }
 0x97c   :  { %2064 = vtanh.f32 %v665_v56 }
 0x984   :  { %v766_v57 = vpop.f32.mrb[12].mxu0 }
 0x985   :  { %v2063_v58 = vpop.eup %2062  ;;  %v767_v59 = vadd.f32 %v2355_v63, %v766_v57  ;;  %v1902_v60 = vpop.f32.mrb[13].mxu0 }
 0x986   :  { %v2065_v61 = vpop.eup %2064  ;;  %v769_v62 = vpop.f32.mrb[14].mxu0  ;;  %v668_v1 = vmul.f32 %v2063_v58, %v2279_v13 }
 0x987   :  { %v772_v2 = vmul.f32 %v767_v59, %v2279_v13  ;;  %v1903_v3 = vpop.f32.mrb[15].mxu0  ;;  %v669_v4 = vmul.f32 %v2065_v61, %v2279_v13 }
 0x988   :  { %v670_v6 = vadd.f32 %v668_v1, %v2292_v24 }
 0x989   :  { %2066 = vtanh.f32 %v772_v2  ;;  %v671_v8 = vadd.f32 %v669_v4, %v2292_v24 }
 0x98a   :  { %682 = vrot.lane.b32.xlu0 %v670_v6, %s2207_s0  ;;  %v678_v21 = vmul.f32 %v674_v53, %v670_v6 }
 0x98b   :  { %684 = vrot.lane.b32.xlu1 %v671_v8, %s2207_s0  ;;  %v679_v23 = vmul.f32 %v675_v20, %v671_v8 }
 0x993   :  { %v2067_v9 = vpop.eup %2066 }
 0x994   :  { %v774_v10 = vmul.f32 %v2067_v9, %v2279_v13 }
 0x996   :  { %v775_v11 = vadd.f32 %v774_v10, %v2292_v24 }
 0x998   :  { %778 = vrot.lane.b32.xlu0 %v775_v11, %s2207_s0  ;;  %v776_v29 = vmul.f32 %v775_v11, %v2440_v47 }
 0x9fc   :  { %v683_v50 = vpop.permute.xlu0 %682 }
 0x9fd   :  { %v685_v12 = vpop.permute.xlu1 %684  ;;  %v688_v15 = vmul.f32 %v683_v50, %v670_v6 }
 0x9fe   :  { %v689_v16 = vmul.f32 %v685_v12, %v671_v8 }
 0x9ff   :  { %692 = vrot.lane.b32.xlu1 %v688_v15, %s2212_s13 }
 0xa00   :  { %694 = vrot.lane.b32.xlu0 %v689_v16, %s2212_s13 }
 0xa0a   :  { %v779_v18 = vpop.permute.xlu0 %778 }
 0xa0b   :  { %v781_v19 = vmul.f32 %v779_v18, %v775_v11 }
 0xa0d   :  { %783 = vrot.lane.b32.xlu1 %v781_v19, %s2212_s13 }
 0xa71   :  { %v693_v22 = vpop.permute.xlu1 %692 }
 0xa72   :  { %v2488_v25 = vadd.f32 %v693_v22, %v678_v21  ;;  %v695_v26 = vpop.permute.xlu0 %694 }
 0xa73   :  { %v2490_v27 = vadd.f32 %v695_v26, %v679_v23 }
 0xa74   :  { %2068 = vtanh.f32 %v2488_v25 }
 0xa75   :  { %2070 = vtanh.f32 %v2490_v27 }
 0xa7e   :  { %v2069_v28 = vpop.eup %2068 }
 0xa7f   :  { %v2071_v30 = vpop.eup %2070  ;;  %v784_v31 = vpop.permute.xlu1 %783  ;;  %704 = vrot.lane.b32.xlu0 %v2069_v28, %s2207_s0 }
 0xa80   :  { %v2496_v5 = vadd.f32 %v784_v31, %v776_v29  ;;  %706 = vrot.lane.b32.xlu1 %v2071_v30, %s2207_s0 }
 0xa82   :  { %2072 = vtanh.f32 %v2496_v5 }
 0xa8c   :  { %v2073_v7 = vpop.eup %2072 }
 0xa8d   :  { %789 = vrot.lane.b32.xlu0 %v2073_v7, %s2207_s0 }
 0xaf1   :  { %v705_v32 = vpop.permute.xlu0 %704 }
 0xaf2   :  { %v707_v33 = vpop.permute.xlu1 %706  ;;  %v710_v35 = vmul.f32 %v705_v32, %v670_v6 }
 0xaf3   :  { %v711_v36 = vmul.f32 %v707_v33, %v671_v8 }
 0xaf4   :  { %v793_v38 = vpack.c.bf16 %v710_v35, %v710_v35 }
 0xaf5   :  { %v794_v47 = vpack.c.bf16 %v711_v36, %v711_v36  ;;  %v905_v42 = vrot.slane %v711_v36, 7 }
 0xaf6   :  { %v797_v46 = vunpack.c.l.b16 %v793_v38 }
 0xaf7   :  { %v798_v48 = vunpack.c.l.b16 %v794_v47  ;;  %v907_v49 = vsel %vm906_vm11, %v905_v42, %v710_v35 }
 0xaf8   :  { %v799_v51 = vrot.slane %v797_v46, 3  ;;  %908 = vrot.lane.b32.xlu0 %v907_v49, %s2212_s13  ;;  %v865_v49 = vrot.slane %v2488_v25, 7 }
 0xaf9   :  { %v800_v52 = vrot.slane %v798_v48, 2 }
 0xafb   :  { %v801_v34 = vsel %vm190_vm6, %v800_v52, %v799_v51  ;;  %v866_v51 = vrot.slane %v2490_v27, 7 }
 0xafc   :  { %v802_v37 = vpack.c.b16 %v801_v34, %v801_v34 }
 0xafe   :  { %803 = vrot.lane.b32.xlu1 %v802_v37, %s2212_s13 }
 0xaff   :  { %v790_v54 = vpop.permute.xlu0 %789 }
 0xb00   :  { %v792_v55 = vmul.f32 %v790_v54, %v775_v11 }
 0xb02   :  { %v912_v56 = vrot.slane %v792_v55, 5 }
 0xb04   :  { %913 = vrot.lane.b32.xlu1 %v912_v56, %s2207_s0 }
 0xb6a   :  { %v909_v58 = vpop.permute.xlu0 %908 }
 0xb70   :  { %v804_v57 = vpop.permute.xlu1 %803 }
 0xb71   :  { %1909 = vmatmul.mubr.msk.bf16.vlgmr.msra.gmra.mrb[12].mxu1 %vm207_vm7, %v804_v57 }
 0xb72   :  { %1913 = vmatpush3.bf16.msra.mxu1 %v2308_v39  ;;  %1920 = vmatprep.mubr.msk.bf16.mxu1 %vm2210_vm0, %v2209_v0 }
 0xb73   :  { %1914 = vmatprep.subr.bf16.mxu1 %v2209_v0 }
 0xb76   :  { %1915 = vmatpush3.bf16.msra.mxu1 %v2313_v41  ;;  %v914_v59 = vpop.permute.xlu1 %913 }
 0xb77   :  { %v916_v60 = vsel %vm207_vm7, %v909_v58, %v914_v59  ;;  %1916 = vmatprep.subr.bf16.mxu1 %v2209_v0 }
 0xb78   :  { %v917_v61 = vpack.c.bf16 %v916_v60, %v916_v60 }
 0xb7a   :  { %v919_v62 = vshrl.u32 %v917_v61, 16  ;;  %v922_v1 = vshll.u32 %v917_v61, 16  ;;  %1917 = vmatpush3.bf16.msra.mxu1 %v2320_v43 }
 0xb7b   :  { %1918 = vmatprep.subr.bf16.mxu1 %v2209_v0 }
 0xb7c   :  { %v921_v2 = vrot.slane %v919_v62, 1  ;;  %v924_v3 = vrot.slane %v922_v1, 2 }
 0xb7e   :  { %v925_v4 = vor.u32 %v924_v3, %v921_v2  ;;  %1919 = vmatpush3.bf16.msra.mxu1 %v2325_v44 }
 0xb7f   :  { %1944 = vmatprep.subr.bf16.mxu1 %v2209_v0 }
 0xb81   :  { %1921 = vmatmul.mubr.msk.bf16.vlgmr.msra.gmra.mrb[16].mxu1 %vm342_vm8, %v925_v4 }
 0xb82   :  { %1945 = vmatpush3.bf16.msra.mxu1 %v2310_v40  ;;  %1948 = vmatprep.mubr.msk.bf16.mxu1 %vm2210_vm0, %v2209_v0 }
 0xb83   :  { %1946 = vmatprep.subr.bf16.mxu1 %v2209_v0 }
 0xb86   :  { %1947 = vmatpush3.bf16.msra.mxu1 %v2328_v45 }
 0xb87   :  { %1952 = vmatprep.subr.bf16.mxu1 %v2209_v0 }
 0xc44   :  { %v842_v6 = vpop.f32.mrb[12].mxu1 }
 0xc45   :  { %v849_v8 = vrot.slane %v842_v6, 4  ;;  %v850_v9 = vrot.slane %v842_v6, 5  ;;  %v1910_v10 = vpop.f32.mrb[13].mxu1 }
 0xc46   :  { %v845_v11 = vpop.f32.mrb[14].mxu1 }
 0xc47   :  { %v853_v50 = vadd.f32 %v849_v8, %v2281_v14  ;;  %v854_v12 = vadd.f32 %v850_v9, %v2283_v17  ;;  %v1911_v15 = vpop.f32.mrb[15].mxu1 }
 0xc49   :  { %v855_v16 = vmul.f32 %v853_v50, %v2279_v13  ;;  %v856_v18 = vmul.f32 %v854_v12, %v2279_v13 }
 0xc4b   :  { %2074 = vtanh.f32 %v855_v16 }
 0xc4c   :  { %2076 = vtanh.f32 %v856_v18 }
 0xc54   :  { %v963_v19 = vpop.f32.mrb[16].mxu1 }
 0xc55   :  { %v2075_v53 = vpop.eup %2074  ;;  %v964_v20 = vadd.f32 %v2355_v63, %v963_v19  ;;  %v1922_v21 = vpop.f32.mrb[17].mxu1 }
 0xc56   :  { %v2077_v22 = vpop.eup %2076  ;;  %v966_v23 = vpop.f32.mrb[18].mxu1  ;;  %v859_v26 = vmul.f32 %v2075_v53, %v2279_v13 }
 0xc57   :  { %v969_v28 = vmul.f32 %v964_v20, %v2279_v13  ;;  %v1923_v29 = vpop.f32.mrb[19].mxu1  ;;  %v860_v30 = vmul.f32 %v2077_v22, %v2279_v13 }
 0xc58   :  { %v861_v31 = vadd.f32 %v859_v26, %v2292_v24 }
 0xc59   :  { %2078 = vtanh.f32 %v969_v28  ;;  %v862_v7 = vadd.f32 %v860_v30, %v2292_v24 }
 0xc5a   :  { %873 = vrot.lane.b32.xlu0 %v861_v31, %s2207_s0  ;;  %v869_v52 = vmul.f32 %v865_v49, %v861_v31 }
 0xc5b   :  { %875 = vrot.lane.b32.xlu1 %v862_v7, %s2207_s0  ;;  %v870_v37 = vmul.f32 %v866_v51, %v862_v7 }
 0xc63   :  { %v2079_v32 = vpop.eup %2078 }
 0xc64   :  { %v971_v33 = vmul.f32 %v2079_v32, %v2279_v13 }
 0xc66   :  { %v972_v35 = vadd.f32 %v971_v33, %v2292_v24 }
 0xc68   :  { %975 = vrot.lane.b32.xlu0 %v972_v35, %s2207_s0  ;;  %v973_v58 = vmul.f32 %v972_v35, %v2496_v5 }
 0xccc   :  { %v874_v36 = vpop.permute.xlu0 %873 }
 0xccd   :  { %v876_v38 = vpop.permute.xlu1 %875  ;;  %v879_v47 = vmul.f32 %v874_v36, %v861_v31 }
 0xcce   :  { %v880_v42 = vmul.f32 %v876_v38, %v862_v7 }
 0xccf   :  { %883 = vrot.lane.b32.xlu1 %v879_v47, %s2212_s13 }
 0xcd0   :  { %885 = vrot.lane.b32.xlu0 %v880_v42, %s2212_s13 }
 0xcda   :  { %v976_v46 = vpop.permute.xlu0 %975 }
 0xcdb   :  { %v978_v48 = vmul.f32 %v976_v46, %v972_v35 }
 0xcdd   :  { %980 = vrot.lane.b32.xlu1 %v978_v48, %s2212_s13 }
 0xd41   :  { %v884_v34 = vpop.permute.xlu1 %883 }
 0xd42   :  { %v2544_v54 = vadd.f32 %v884_v34, %v869_v52  ;;  %v886_v55 = vpop.permute.xlu0 %885 }
 0xd43   :  { %v2546_v56 = vadd.f32 %v886_v55, %v870_v37 }
 0xd44   :  { %2080 = vtanh.f32 %v2544_v54 }
 0xd45   :  { %2082 = vtanh.f32 %v2546_v56 }
 0xd4e   :  { %v2081_v57 = vpop.eup %2080 }
 0xd4f   :  { %v2083_v59 = vpop.eup %2082  ;;  %v981_v60 = vpop.permute.xlu1 %980  ;;  %895 = vrot.lane.b32.xlu0 %v2081_v57, %s2207_s0 }
 0xd50   :  { %v2552_v25 = vadd.f32 %v981_v60, %v973_v58  ;;  %897 = vrot.lane.b32.xlu1 %v2083_v59, %s2207_s0  ;;  %v1062_v60 = vrot.slane %v2544_v54, 7 }
 0xd52   :  { %2084 = vtanh.f32 %v2552_v25 }
 0xd5c   :  { %v2085_v27 = vpop.eup %2084 }
 0xd5d   :  { %986 = vrot.lane.b32.xlu0 %v2085_v27, %s2207_s0  ;;  %v1063_v27 = vrot.slane %v2546_v56, 7 }
 0xdc1   :  { %v896_v61 = vpop.permute.xlu0 %895 }
 0xdc2   :  { %v898_v62 = vpop.permute.xlu1 %897  ;;  %v901_v1 = vmul.f32 %v896_v61, %v861_v31 }
 0xdc3   :  { %v902_v2 = vmul.f32 %v898_v62, %v862_v7 }
 0xdc4   :  { %v990_v3 = vpack.c.bf16 %v901_v1, %v901_v1 }
 0xdc5   :  { %v991_v5 = vpack.c.bf16 %v902_v2, %v902_v2  ;;  %v1102_v4 = vrot.slane %v902_v2, 7 }
 0xdc6   :  { %v994_v6 = vunpack.c.l.b16 %v990_v3 }
 0xdc7   :  { %v995_v8 = vunpack.c.l.b16 %v991_v5  ;;  %v1104_v9 = vsel %vm1103_vm12, %v1102_v4, %v901_v1 }
 0xdc8   :  { %v996_v10 = vrot.slane %v994_v6, 4  ;;  %1105 = vrot.lane.b32.xlu0 %v1104_v9, %s2212_s13 }
 0xdc9   :  { %v997_v11 = vrot.slane %v995_v8, 3 }
 0xdcb   :  { %v998_v50 = vsel %vm190_vm6, %v997_v11, %v996_v10 }
 0xdcc   :  { %v999_v12 = vpack.c.b16 %v998_v50, %v998_v50 }
 0xdce   :  { %1000 = vrot.lane.b32.xlu1 %v999_v12, %s2212_s13 }
 0xdcf   :  { %v987_v15 = vpop.permute.xlu0 %986 }
 0xdd0   :  { %v989_v16 = vmul.f32 %v987_v15, %v972_v35 }
 0xdd2   :  { %v1109_v18 = vrot.slane %v989_v16, 4 }
 0xdd4   :  { %1110 = vrot.lane.b32.xlu1 %v1109_v18, %s2207_s0 }
 0xe3a   :  { %v1106_v20 = vpop.permute.xlu0 %1105 }
 0xe40   :  { %v1001_v19 = vpop.permute.xlu1 %1000 }
 0xe41   :  { %1929 = vmatmul.mubr.msk.bf16.vlgmr.msra.gmra.mrb[16].mxu0 %vm207_vm7, %v1001_v19 }
 0xe42   :  { %1933 = vmatpush3.bf16.msra.mxu0 %v2308_v39  ;;  %1940 = vmatprep.mubr.msk.bf16.mxu0 %vm2210_vm0, %v2209_v0 }
 0xe43   :  { %1934 = vmatprep.subr.bf16.mxu0 %v2209_v0 }
 0xe46   :  { %1935 = vmatpush3.bf16.msra.mxu0 %v2313_v41  ;;  %v1111_v53 = vpop.permute.xlu1 %1110 }
 0xe47   :  { %1936 = vmatprep.subr.bf16.mxu0 %v2209_v0  ;;  %v1113_v21 = vsel %vm207_vm7, %v1106_v20, %v1111_v53 }
 0xe48   :  { %v1114_v22 = vpack.c.bf16 %v1113_v21, %v1113_v21 }
 0xe4a   :  { %1937 = vmatpush3.bf16.msra.mxu0 %v2320_v43  ;;  %v1116_v39 = vrot.slane %v1114_v22, 2 }
 0xe4b   :  { %1938 = vmatprep.subr.bf16.mxu0 %v2209_v0 }
 0xe4e   :  { %1939 = vmatpush3.bf16.msra.mxu0 %v2325_v44 }
 0xe4f   :  { %1964 = vmatprep.subr.bf16.mxu0 %v2209_v0 }
 0xe51   :  { %1941 = vmatmul.mubr.msk.bf16.vlgmr.msra.gmra.mrb[20].mxu0 %vm342_vm8, %v1116_v39 }
 0xe52   :  { %1965 = vmatpush3.bf16.msra.mxu0 %v2310_v40  ;;  %1968 = vmatprep.mubr.msk.bf16.mxu0 %vm2210_vm0, %v2209_v0 }
 0xe53   :  { %1966 = vmatprep.subr.bf16.mxu0 %v2209_v0 }
 0xe56   :  { %1967 = vmatpush3.bf16.msra.mxu0 %v2328_v45 }
 0xe57   :  { %1972 = vmatprep.subr.bf16.mxu0 %v2209_v0 }
 0xf14   :  { %v1039_v41 = vpop.f32.mrb[16].mxu0 }
 0xf15   :  { %v1046_v43 = vrot.slane %v1039_v41, 3  ;;  %v1047_v23 = vrot.slane %v1039_v41, 4  ;;  %v1930_v44 = vpop.f32.mrb[17].mxu0 }
 0xf16   :  { %v1042_v26 = vpop.f32.mrb[18].mxu0 }
 0xf17   :  { %v1050_v28 = vadd.f32 %v1046_v43, %v2281_v14  ;;  %v1051_v29 = vadd.f32 %v1047_v23, %v2283_v17  ;;  %v1931_v30 = vpop.f32.mrb[19].mxu0  ;;  %v2618_v26 = vld [vmem:[#allocation5 + $0x20] sm:$0xff]  }
 0xf19   :  { %v1052_v40 = vmul.f32 %v1050_v28, %v2279_v13  ;;  %v1053_v31 = vmul.f32 %v1051_v29, %v2279_v13  ;;  %v2624_v29 = vld [vmem:[#allocation5 + $0x28] sm:$0xff]  }
 0xf1b   :  { %2086 = vtanh.f32 %v1052_v40 }
 0xf1c   :  { %2088 = vtanh.f32 %v1053_v31 }
 0xf24   :  { %v1154_v7 = vpop.f32.mrb[20].mxu0 }
 0xf25   :  { %v2087_v45 = vpop.eup %2086  ;;  %v1155_v32 = vadd.f32 %v2355_v63, %v1154_v7  ;;  %v1942_v33 = vpop.f32.mrb[21].mxu0 }
 0xf26   :  { %v2089_v35 = vpop.eup %2088  ;;  %v1157_v36 = vpop.f32.mrb[22].mxu0  ;;  %v1056_v38 = vmul.f32 %v2087_v45, %v2279_v13 }
 0xf27   :  { %v1160_v47 = vmul.f32 %v1155_v32, %v2279_v13  ;;  %v1943_v42 = vpop.f32.mrb[23].mxu0  ;;  %v1057_v46 = vmul.f32 %v2089_v35, %v2279_v13  ;;  %v2629_v32 = vld [vmem:[#allocation5 + $0x30] sm:$0xff]  }
 0xf28   :  { %v1058_v48 = vadd.f32 %v1056_v38, %v2292_v24  ;;  %v2633_v38 = vld [vmem:[#allocation5 + $0x38] sm:$0xff]  }
 0xf29   :  { %2090 = vtanh.f32 %v1160_v47  ;;  %v1059_v49 = vadd.f32 %v1057_v46, %v2292_v24 }
 0xf2a   :  { %1070 = vrot.lane.b32.xlu0 %v1058_v48, %s2207_s0  ;;  %v1066_v61 = vmul.f32 %v1062_v60, %v1058_v48 }
 0xf2b   :  { %1072 = vrot.lane.b32.xlu1 %v1059_v49, %s2207_s0  ;;  %v1067_v1 = vmul.f32 %v1063_v27, %v1059_v49 }
 0xf33   :  { %v2091_v63 = vpop.eup %2090 }
 0xf34   :  { %v1162_v51 = vmul.f32 %v2091_v63, %v2279_v13 }
 0xf36   :  { %v1163_v52 = vadd.f32 %v1162_v51, %v2292_v24 }
 0xf38   :  { %1166 = vrot.lane.b32.xlu0 %v1163_v52, %s2207_s0  ;;  %v1164_v6 = vmul.f32 %v1163_v52, %v2552_v25 }
 0xf9c   :  { %v1071_v34 = vpop.permute.xlu0 %1070 }
 0xf9d   :  { %v1073_v37 = vpop.permute.xlu1 %1072  ;;  %v1076_v55 = vmul.f32 %v1071_v34, %v1058_v48 }
 0xf9e   :  { %v1077_v57 = vmul.f32 %v1073_v37, %v1059_v49 }
 0xf9f   :  { %1080 = vrot.lane.b32.xlu1 %v1076_v55, %s2212_s13 }
 0xfa0   :  { %1082 = vrot.lane.b32.xlu0 %v1077_v57, %s2212_s13 }
 0xfaa   :  { %v1167_v58 = vpop.permute.xlu0 %1166 }
 0xfab   :  { %v1169_v59 = vmul.f32 %v1167_v58, %v1163_v52  ;;  %v2654_v58 = vld [vmem:[%s2760_s2 + $0x1] ss:$0 sm:$0xff] }
 0xfad   :  { %1171 = vrot.lane.b32.xlu1 %v1169_v59, %s2212_s13 }
0x1011   :  { %v1081_v62 = vpop.permute.xlu1 %1080 }
0x1012   :  { %v2600_v2 = vadd.f32 %v1081_v62, %v1066_v61  ;;  %v1083_v3 = vpop.permute.xlu0 %1082 }
0x1013   :  { %v2602_v5 = vadd.f32 %v1083_v3, %v1067_v1 }
0x1014   :  { %2092 = vtanh.f32 %v2600_v2 }
0x1015   :  { %2094 = vtanh.f32 %v2602_v5 }
0x101e   :  { %v2093_v4 = vpop.eup %2092 }
0x101f   :  { %v2095_v8 = vpop.eup %2094  ;;  %v1172_v9 = vpop.permute.xlu1 %1171  ;;  %1092 = vrot.lane.b32.xlu0 %v2093_v4, %s2207_s0 }
0x1020   :  { %v2608_v54 = vadd.f32 %v1172_v9, %v1164_v6  ;;  %1094 = vrot.lane.b32.xlu1 %v2095_v8, %s2207_s0 }
0x1022   :  { %2096 = vtanh.f32 %v2608_v54 }
0x102c   :  { %v2097_v56 = vpop.eup %2096 }
0x102d   :  { %1177 = vrot.lane.b32.xlu0 %v2097_v56, %s2207_s0 }
0x1091   :  { %v1093_v10 = vpop.permute.xlu0 %1092 }
0x1092   :  { %v1095_v11 = vpop.permute.xlu1 %1094  ;;  %v1098_v50 = vmul.f32 %v1093_v10, %v1058_v48 }
0x1093   :  { %v1099_v12 = vmul.f32 %v1095_v11, %v1059_v49 }
0x1094   :  { %v1181_v15 = vpack.c.bf16 %v1098_v50, %v1098_v50 }
0x1095   :  { %v1182_v25 = vpack.c.bf16 %v1099_v12, %v1099_v12  ;;  %v1293_v16 = vrot.slane %v1099_v12, 7 }
0x1096   :  { %v1185_v18 = vunpack.c.l.b16 %v1181_v15 }
0x1097   :  { %v1186_v19 = vunpack.c.l.b16 %v1182_v25  ;;  %v1295_v53 = vsel %vm1294_vm13, %v1293_v16, %v1098_v50 }
0x1098   :  { %v1187_v20 = vrot.slane %v1185_v18, 5  ;;  %1296 = vrot.lane.b32.xlu0 %v1295_v53, %s2212_s13  ;;  %v1253_v18 = vrot.slane %v2600_v2, 7 }
0x1099   :  { %v1188_v21 = vrot.slane %v1186_v19, 4  ;;  %v1254_v19 = vrot.slane %v2602_v5, 7 }
0x109b   :  { %v1189_v22 = vsel %vm190_vm6, %v1188_v21, %v1187_v20 }
0x109c   :  { %v1190_v39 = vpack.c.b16 %v1189_v22, %v1189_v22 }
0x109e   :  { %1191 = vrot.lane.b32.xlu1 %v1190_v39, %s2212_s13 }
0x109f   :  { %v1178_v41 = vpop.permute.xlu0 %1177 }
0x10a0   :  { %v1180_v43 = vmul.f32 %v1178_v41, %v1163_v52 }
0x10a2   :  { %v1300_v23 = vrot.slane %v1180_v43, 3 }
0x10a4   :  { %1301 = vrot.lane.b32.xlu1 %v1300_v23, %s2207_s0 }
0x110a   :  { %v1297_v28 = vpop.permute.xlu0 %1296 }
0x1110   :  { %v1192_v44 = vpop.permute.xlu1 %1191 }
0x1111   :  { %1949 = vmatmul.mubr.msk.bf16.vlgmr.msra.gmra.mrb[20].mxu1 %vm207_vm7, %v1192_v44 }
0x1112   :  { %1953 = vmatpush3.bf16.msra.mxu1 %v2618_v26  ;;  %1960 = vmatprep.mubr.msk.bf16.mxu1 %vm2210_vm0, %v2209_v0 }
0x1113   :  { %1954 = vmatprep.subr.bf16.mxu1 %v2209_v0 }
0x1116   :  { %1955 = vmatpush3.bf16.msra.mxu1 %v2624_v29  ;;  %v1302_v30 = vpop.permute.xlu1 %1301 }
0x1117   :  { %v1304_v40 = vsel %vm207_vm7, %v1297_v28, %v1302_v30  ;;  %1956 = vmatprep.subr.bf16.mxu1 %v2209_v0 }
0x1118   :  { %v1305_v31 = vpack.c.bf16 %v1304_v40, %v1304_v40 }
0x111a   :  { %v1307_v7 = vshrl.u32 %v1305_v31, 16  ;;  %v1310_v45 = vshll.u32 %v1305_v31, 16  ;;  %1957 = vmatpush3.bf16.msra.mxu1 %v2629_v32 }
0x111b   :  { %1958 = vmatprep.subr.bf16.mxu1 %v2209_v0 }
0x111c   :  { %v1309_v33 = vrot.slane %v1307_v7, 2  ;;  %v1312_v35 = vrot.slane %v1310_v45, 3 }
0x111e   :  { %v1313_v36 = vor.u32 %v1312_v35, %v1309_v33  ;;  %1959 = vmatpush3.bf16.msra.mxu1 %v2633_v38 }
0x111f   :  { %1984 = vmatprep.subr.bf16.mxu1 %v2209_v0 }
0x1121   :  { %1961 = vmatmul.mubr.msk.bf16.vlgmr.msra.gmra.mrb[24].mxu1 %vm342_vm8, %v1313_v36 }
0x1122   :  { %1985 = vmatpush3.bf16.msra.mxu1 %v2618_v26  ;;  %1992 = vmatprep.mubr.msk.bf16.mxu1 %vm2210_vm0, %v2209_v0 }
0x1123   :  { %1986 = vmatprep.subr.bf16.mxu1 %v2209_v0 }
0x1126   :  { %1987 = vmatpush3.bf16.msra.mxu1 %v2624_v29 }
0x1127   :  { %1988 = vmatprep.subr.bf16.mxu1 %v2209_v0 }
0x112a   :  { %1989 = vmatpush3.bf16.msra.mxu1 %v2629_v32 }
0x112b   :  { %1990 = vmatprep.subr.bf16.mxu1 %v2209_v0 }
0x112e   :  { %1991 = vmatpush3.bf16.msra.mxu1 %v2633_v38 }
0x11e4   :  { %v1230_v47 = vpop.f32.mrb[20].mxu1 }
0x11e5   :  { %v1237_v42 = vrot.slane %v1230_v47, 2  ;;  %v1238_v46 = vrot.slane %v1230_v47, 3  ;;  %v1950_v48 = vpop.f32.mrb[21].mxu1 }
0x11e6   :  { %v1233_v49 = vpop.f32.mrb[22].mxu1 }
0x11e7   :  { %v1241_v63 = vadd.f32 %v1237_v42, %v2281_v14  ;;  %v1242_v51 = vadd.f32 %v1238_v46, %v2283_v17  ;;  %v1951_v52 = vpop.f32.mrb[23].mxu1 }
0x11e9   :  { %v1243_v34 = vmul.f32 %v1241_v63, %v2279_v13  ;;  %v1244_v37 = vmul.f32 %v1242_v51, %v2279_v13 }
0x11eb   :  { %2098 = vtanh.f32 %v1243_v34 }
0x11ec   :  { %2100 = vtanh.f32 %v1244_v37 }
0x11f4   :  { %v1351_v55 = vpop.f32.mrb[24].mxu1 }
0x11f5   :  { %v2099_v57 = vpop.eup %2098  ;;  %v1352_v59 = vadd.f32 %v2654_v58, %v1351_v55  ;;  %v1962_v60 = vpop.f32.mrb[25].mxu1 }
0x11f6   :  { %v2101_v27 = vpop.eup %2100  ;;  %v1354_v61 = vpop.f32.mrb[26].mxu1  ;;  %v1247_v62 = vmul.f32 %v2099_v57, %v2279_v13 }
0x11f7   :  { %v1357_v1 = vmul.f32 %v1352_v59, %v2279_v13  ;;  %v1963_v3 = vpop.f32.mrb[27].mxu1  ;;  %v1248_v4 = vmul.f32 %v2101_v27, %v2279_v13 }
0x11f8   :  { %v1249_v6 = vadd.f32 %v1247_v62, %v2292_v24 }
0x11f9   :  { %2102 = vtanh.f32 %v1357_v1  ;;  %v1250_v8 = vadd.f32 %v1248_v4, %v2292_v24 }
0x11fa   :  { %1261 = vrot.lane.b32.xlu0 %v1249_v6, %s2207_s0  ;;  %v1257_v53 = vmul.f32 %v1253_v18, %v1249_v6 }
0x11fb   :  { %1263 = vrot.lane.b32.xlu1 %v1250_v8, %s2207_s0  ;;  %v1258_v21 = vmul.f32 %v1254_v19, %v1250_v8 }
0x1203   :  { %v2103_v9 = vpop.eup %2102 }
0x1204   :  { %v1359_v56 = vmul.f32 %v2103_v9, %v2279_v13 }
0x1206   :  { %v1360_v10 = vadd.f32 %v1359_v56, %v2292_v24 }
0x1208   :  { %1363 = vrot.lane.b32.xlu0 %v1360_v10, %s2207_s0  ;;  %v1361_v23 = vmul.f32 %v1360_v10, %v2608_v54 }
0x126c   :  { %v1262_v11 = vpop.permute.xlu0 %1261 }
0x126d   :  { %v1264_v50 = vpop.permute.xlu1 %1263  ;;  %v1267_v12 = vmul.f32 %v1262_v11, %v1249_v6 }
0x126e   :  { %v1268_v15 = vmul.f32 %v1264_v50, %v1250_v8 }
0x126f   :  { %1271 = vrot.lane.b32.xlu1 %v1267_v12, %s2212_s13 }
0x1270   :  { %1273 = vrot.lane.b32.xlu0 %v1268_v15, %s2212_s13 }
0x127a   :  { %v1364_v25 = vpop.permute.xlu0 %1363 }
0x127b   :  { %v1366_v16 = vmul.f32 %v1364_v25, %v1360_v10 }
0x127d   :  { %1368 = vrot.lane.b32.xlu1 %v1366_v16, %s2212_s13 }
0x12e1   :  { %v1272_v20 = vpop.permute.xlu1 %1271 }
0x12e2   :  { %v2672_v22 = vadd.f32 %v1272_v20, %v1257_v53  ;;  %v1274_v39 = vpop.permute.xlu0 %1273 }
0x12e3   :  { %v2674_v41 = vadd.f32 %v1274_v39, %v1258_v21 }
0x12e4   :  { %2104 = vtanh.f32 %v2672_v22 }
0x12e5   :  { %2106 = vtanh.f32 %v2674_v41 }
0x12ee   :  { %v2105_v43 = vpop.eup %2104 }
0x12ef   :  { %v2107_v44 = vpop.eup %2106  ;;  %v1369_v28 = vpop.permute.xlu1 %1368  ;;  %1283 = vrot.lane.b32.xlu0 %v2105_v43, %s2207_s0 }
0x12f0   :  { %v2680_v2 = vadd.f32 %v1369_v28, %v1361_v23  ;;  %1285 = vrot.lane.b32.xlu1 %v2107_v44, %s2207_s0  ;;  %v1451_v44 = vrot.slane %v2674_v41, 7 }
0x12f2   :  { %2108 = vtanh.f32 %v2680_v2 }
0x12fc   :  { %v2109_v5 = vpop.eup %2108 }
0x12fd   :  { %1374 = vrot.lane.b32.xlu0 %v2109_v5, %s2207_s0 }
0x1361   :  { %v1284_v30 = vpop.permute.xlu0 %1283 }
0x1362   :  { %v1286_v40 = vpop.permute.xlu1 %1285  ;;  %v1289_v31 = vmul.f32 %v1284_v30, %v1249_v6  ;;  %v1450_v30 = vrot.slane %v2672_v22, 7 }
0x1363   :  { %v1290_v7 = vmul.f32 %v1286_v40, %v1250_v8 }
0x1364   :  { %v1378_v45 = vpack.c.bf16 %v1289_v31, %v1289_v31 }
0x1365   :  { %v1379_v54 = vpack.c.bf16 %v1290_v7, %v1290_v7  ;;  %v1490_v33 = vrot.slane %v1290_v7, 7 }
0x1366   :  { %v1382_v35 = vunpack.c.l.b16 %v1378_v45 }
0x1367   :  { %v1383_v36 = vunpack.c.l.b16 %v1379_v54  ;;  %v1492_v47 = vsel %vm1491_vm14, %v1490_v33, %v1289_v31 }
0x1368   :  { %v1384_v42 = vrot.slane %v1382_v35, 6  ;;  %1493 = vrot.lane.b32.xlu0 %v1492_v47, %s2212_s13 }
0x1369   :  { %v1385_v46 = vrot.slane %v1383_v36, 5 }
0x136b   :  { %v1386_v48 = vsel %vm190_vm6, %v1385_v46, %v1384_v42 }
0x136c   :  { %v1387_v49 = vpack.c.b16 %v1386_v48, %v1386_v48 }
0x136e   :  { %1388 = vrot.lane.b32.xlu1 %v1387_v49, %s2212_s13 }
0x136f   :  { %v1375_v63 = vpop.permute.xlu0 %1374 }
0x1370   :  { %v1377_v51 = vmul.f32 %v1375_v63, %v1360_v10 }
0x1372   :  { %v1497_v52 = vrot.slane %v1377_v51, 2 }
0x1374   :  { %1498 = vrot.lane.b32.xlu1 %v1497_v52, %s2207_s0 }
0x13da   :  { %v1494_v55 = vpop.permute.xlu0 %1493 }
0x13e0   :  { %v1389_v34 = vpop.permute.xlu1 %1388 }
0x13e1   :  { %1969 = vmatmul.mubr.msk.bf16.vlgmr.msra.gmra.mrb[24].mxu0 %vm207_vm7, %v1389_v34 }
0x13e2   :  { %1973 = vmatpush3.bf16.msra.mxu0 %v2618_v26  ;;  %1980 = vmatprep.mubr.msk.bf16.mxu0 %vm2210_vm0, %v2209_v0 }
0x13e3   :  { %1974 = vmatprep.subr.bf16.mxu0 %v2209_v0 }
0x13e6   :  { %1975 = vmatpush3.bf16.msra.mxu0 %v2624_v29  ;;  %v1499_v37 = vpop.permute.xlu1 %1498 }
0x13e7   :  { %1976 = vmatprep.subr.bf16.mxu0 %v2209_v0  ;;  %v1501_v57 = vsel %vm207_vm7, %v1494_v55, %v1499_v37 }
0x13e8   :  { %v1502_v59 = vpack.c.bf16 %v1501_v57, %v1501_v57 }
0x13ea   :  { %1977 = vmatpush3.bf16.msra.mxu0 %v2629_v32  ;;  %v1504_v26 = vrot.slane %v1502_v59, 3 }
0x13eb   :  { %1978 = vmatprep.subr.bf16.mxu0 %v2209_v0 }
0x13ee   :  { %1979 = vmatpush3.bf16.msra.mxu0 %v2633_v38 }
0x13ef   :  { %1996 = vmatprep.subr.bf16.mxu0 %v2209_v0 }
0x13f1   :  { %1981 = vmatmul.mubr.msk.bf16.vlgmr.msra.gmra.mrb[28].mxu0 %vm342_vm8, %v1504_v26 }
0x13f2   :  { %2000 = vmatprep.mubr.msk.bf16.mxu0 %vm2210_vm0, %v2209_v0 }
0x14b4   :  { %v1427_v29 = vpop.f32.mrb[24].mxu0 }
0x14b5   :  { %v1434_v60 = vrot.slane %v1427_v29, 1  ;;  %v1435_v27 = vrot.slane %v1427_v29, 2  ;;  %v1970_v61 = vpop.f32.mrb[25].mxu0 }
0x14b6   :  { %v1430_v62 = vpop.f32.mrb[26].mxu0 }
0x14b7   :  { %v1438_v32 = vadd.f32 %v1434_v60, %v2281_v14  ;;  %v1439_v1 = vadd.f32 %v1435_v27, %v2283_v17  ;;  %v1971_v3 = vpop.f32.mrb[27].mxu0 }
0x14b9   :  { %v1440_v38 = vmul.f32 %v1438_v32, %v2279_v13  ;;  %v1441_v4 = vmul.f32 %v1439_v1, %v2279_v13 }
0x14bb   :  { %2110 = vtanh.f32 %v1440_v38 }
0x14bc   :  { %2112 = vtanh.f32 %v1441_v4 }
0x14c4   :  { %v1542_v6 = vpop.f32.mrb[28].mxu0 }
0x14c5   :  { %v2111_v8 = vpop.eup %2110  ;;  %v1543_v9 = vadd.f32 %v2654_v58, %v1542_v6  ;;  %v1982_v56 = vpop.f32.mrb[29].mxu0 }
0x14c6   :  { %v2113_v10 = vpop.eup %2112  ;;  %v1545_v11 = vpop.f32.mrb[30].mxu0  ;;  %v1444_v15 = vmul.f32 %v2111_v8, %v2279_v13 }
0x14c7   :  { %v1548_v50 = vmul.f32 %v1543_v9, %v2279_v13  ;;  %v1983_v12 = vpop.f32.mrb[31].mxu0  ;;  %v1445_v14 = vmul.f32 %v2113_v10, %v2279_v13 }
0x14c8   :  { %v1446_v25 = vadd.f32 %v1444_v15, %v2292_v24  ;;  %v2029_v15 = vld [vmem:[#allocation5 + $0x48] sm:$0xff]  }
0x14c9   :  { %2114 = vtanh.f32 %v1548_v50  ;;  %v1447_v17 = vadd.f32 %v1445_v14, %v2292_v24 }
0x14ca   :  { %v1454_v31 = vmul.f32 %v1450_v30, %v1446_v25 }
0x14cb   :  { %1460 = vrot.lane.b32.xlu0 %v1447_v17, %s2207_s0  ;;  %v1455_v28 = vmul.f32 %v1451_v44, %v1447_v17 }
0x14cf   :  { %1458 = vrot.lane.b32.xlu0 %v1446_v25, %s2207_s0 }
0x14d3   :  { %v2115_v16 = vpop.eup %2114 }
0x14d4   :  { %v1550_v18 = vmul.f32 %v2115_v16, %v2279_v13 }
0x14d6   :  { %v1551_v19 = vadd.f32 %v1550_v18, %v2292_v24 }
0x14d8   :  { %1554 = vrot.lane.b32.xlu1 %v1551_v19, %s2207_s0  ;;  %v1552_v54 = vmul.f32 %v1551_v19, %v2680_v2 }
0x153d   :  { %v1461_v53 = vpop.permute.xlu0 %1460 }
0x153e   :  { %v1465_v20 = vmul.f32 %v1461_v53, %v1447_v17 }
0x1540   :  { %1470 = vrot.lane.b32.xlu1 %v1465_v20, %s2212_s13 }
0x1541   :  { %v1459_v21 = vpop.permute.xlu0 %1458 }
0x1542   :  { %v1464_v39 = vmul.f32 %v1459_v21, %v1446_v25 }
0x1544   :  { %1468 = vrot.lane.b32.xlu1 %v1464_v39, %s2212_s13 }
0x154a   :  { %v1555_v43 = vpop.permute.xlu1 %1554 }
0x154b   :  { %v1557_v23 = vmul.f32 %v1555_v43, %v1551_v19 }
0x154d   :  { %1559 = vrot.lane.b32.xlu0 %v1557_v23, %s2212_s13 }
0x15b2   :  { %v1471_v5 = vpop.permute.xlu1 %1470 }
0x15b3   :  { %v1475_v40 = vadd.f32 %v1471_v5, %v1455_v28 }
0x15b5   :  { %2116 = vtanh.f32 %v1475_v40 }
0x15b6   :  { %v1469_v7 = vpop.permute.xlu1 %1468 }
0x15b7   :  { %v1474_v45 = vadd.f32 %v1469_v7, %v1454_v31 }
0x15b9   :  { %2118 = vtanh.f32 %v1474_v45 }
0x15bf   :  { %v2117_v33 = vpop.eup %2116  ;;  %v1560_v35 = vpop.permute.xlu0 %1559 }
0x15c0   :  { %v1562_v36 = vadd.f32 %v1560_v35, %v1552_v54  ;;  %1482 = vrot.lane.b32.xlu0 %v2117_v33, %s2207_s0 }
0x15c2   :  { %2120 = vtanh.f32 %v1562_v36 }
0x15c3   :  { %v2119_v47 = vpop.eup %2118 }
0x15c4   :  { %1480 = vrot.lane.b32.xlu0 %v2119_v47, %s2207_s0 }
0x15cc   :  { %v2121_v41 = vpop.eup %2120 }
0x15cd   :  { %1565 = vrot.lane.b32.xlu1 %v2121_v41, %s2207_s0 }
0x1632   :  { %v1483_v22 = vpop.permute.xlu0 %1482 }
0x1633   :  { %v1487_v42 = vmul.f32 %v1483_v22, %v1447_v17  ;;  %v2028_v17 = vld [vmem:[#allocation5 + $0x40] sm:$0xff]  }
0x1634   :  { %1997 = vmatpush3.bf16.msra.mxu0 %v2028_v17 }
0x1635   :  { %v1571_v48 = vrot.slane %v1487_v42, 7  ;;  %1998 = vmatprep.subr.bf16.mxu0 %v2209_v0 }
0x1636   :  { %v1481_v46 = vpop.permute.xlu0 %1480 }
0x1637   :  { %v1486_v49 = vmul.f32 %v1481_v46, %v1446_v25 }
0x1638   :  { %1999 = vmatpush3.bf16.msra.mxu0 %v2029_v15 }
0x1639   :  { %v2015_v63 = vpack.i.bf16 %v1571_v48, %v1486_v49 }
0x163b   :  { %2016 = vrot.lane.b32.xlu1 %v2015_v63, %s2212_s13 }
0x163f   :  { %v1566_v2 = vpop.permute.xlu1 %1565 }
0x1640   :  { %v1568_v51 = vmul.f32 %v1566_v2, %v1551_v19  ;;  %v1765_v19 = vld [vmem:[%s2760_s2 + $0x2] ss:$0 sm:$0xff] }
0x1642   :  { %v1579_v52 = vrot.slane %v1568_v51, 1 }
0x1644   :  { %1580 = vrot.lane.b32.xlu0 %v1579_v52, %s2207_s0 }
0x16ad   :  { %v2017_v34 = vpop.permute.xlu1 %2016 }
0x16ae   :  { %v2019_v37 = vunpack.i.h.bf16 %v2017_v34  ;;  %v2018_v55 = vunpack.i.l.bf16 %v2017_v34 }
0x16b6   :  { %v1581_v57 = vpop.permute.xlu0 %1580 }
0x16b7   :  { %v1583_v59 = vsel %vm207_vm7, %v2018_v55, %v1581_v57  ;;  %v1584_v26 = vsel %vm207_vm7, %v2019_v37, %v1581_v57 }
0x16b8   :  { %v1585_v29 = vpack.c.bf16 %v1584_v26, %v1583_v59 }
0x16ba   :  { %v1587_v60 = vshrl.u32 %v1585_v29, 16  ;;  %v1590_v27 = vshll.u32 %v1585_v29, 16 }
0x16bc   :  { %v1589_v61 = vrot.slane %v1587_v60, 3  ;;  %v1592_v62 = vrot.slane %v1590_v27, 4 }
0x16be   :  { %v1593_v32 = vor.u32 %v1592_v62, %v1589_v61 }
0x16c0   :  { %1993 = vmatmul.mubr.msk.bf16.vlgmr.msra.gmra.mrb[28].mxu1 %vm342_vm8, %v1593_v32 }
0x1793   :  { %v1631_v1 = vpop.f32.mrb[28].mxu1 }
0x1794   :  { %v1632_v3 = vadd.f32 %v2654_v58, %v1631_v1  ;;  %v1994_v38 = vpop.f32.mrb[29].mxu1 }
0x1795   :  { %v1634_v4 = vpop.f32.mrb[30].mxu1 }
0x1796   :  { %v1637_v6 = vmul.f32 %v1632_v3, %v2279_v13  ;;  %v1995_v8 = vpop.f32.mrb[31].mxu1 }
0x1798   :  { %2122 = vtanh.f32 %v1637_v6 }
0x17a2   :  { %v2123_v9 = vpop.eup %2122 }
0x17a3   :  { %v1639_v56 = vmul.f32 %v2123_v9, %v2279_v13 }
0x17a5   :  { %v1640_v10 = vadd.f32 %v1639_v56, %v2292_v24 }
0x17a7   :  { %1643 = vrot.lane.b32.xlu1 %v1640_v10, %s2207_s0  ;;  %v1641_v12 = vmul.f32 %v1640_v10, %v1562_v36 }
0x1819   :  { %v1644_v11 = vpop.permute.xlu1 %1643 }
0x181a   :  { %v1646_v50 = vmul.f32 %v1644_v11, %v1640_v10 }
0x181c   :  { %1648 = vrot.lane.b32.xlu0 %v1646_v50, %s2212_s13 }
0x188e   :  { %v1649_v14 = vpop.permute.xlu0 %1648 }
0x188f   :  { %v1651_v58 = vadd.f32 %v1649_v14, %v1641_v12 }
0x1891   :  { %2124 = vtanh.f32 %v1651_v58 }
0x189b   :  { %v2125_v25 = vpop.eup %2124 }
0x189c   :  { %1654 = vrot.lane.b32.xlu1 %v2125_v25, %s2207_s0 }
0x190e   :  { %v1655_v13 = vpop.permute.xlu1 %1654 }
0x190f   :  { %v1657_v24 = vmul.f32 %v1655_v13, %v1640_v10 }
0x1911   :  { %v1658_v16 = vpack.c.bf16 %v1657_v24, %v1657_v24 }
0x1913   :  { %1664 = vrot.lane.b32.xlu0 %v1658_v16, %s2212_s13 }
0x1985   :  { %v1665_v18 = vpop.permute.xlu0 %1664 }
0x1986   :  { %2001 = vmatmul.mubr.msk.bf16.vlgmr.msra.gmra.mrb[32].mxu0 %vm207_vm7, %v1665_v18 }
0x1a59   :  { %v1715_v53 = vpop.f32.mrb[32].mxu0 }
0x1a5a   :  { %v1716_v0 = vadd.f32 %v1765_v19, %v1715_v53  ;;  %v2002_v20 = vpop.f32.mrb[33].mxu0 }
0x1a5b   :  { %v1718_v21 = vpop.f32.mrb[34].mxu0 }
0x1a5c   :  { %v2003_v39 = vpop.f32.mrb[35].mxu0  ;;  %1722 = vst.msk [vmem:[#allocation7] sm:$0x3] %vm1721_vm15, %v1716_v0 }
0x1a5d   :  { %2186 = shalt.err (!%p2183_p6)
}
0x1a5e   :  { %s2187_s2 = scalar_lea.hbm %s2761_s3, 32 }
0x1a5f   :  { %p2188_p7 = scmp.ne.s32.totalorder %s2761_s3, %s2187_s2  ;;  %p2191_p8 = scmp.lt.u32.totalorder %s2187_s2, %s2761_s3 }
0x1a61   :  { %p2193_p9 = pnand %p2191_p8, %p2188_p7 }
0x1a63   :  { %2196 = shalt.err (!%p2193_p9)
}
0x1a64   :  { %1732 = dma.vmem_to_hbm [thread:$0]  %s1730_s21, 32, %s2761_s3, [#allocation4]  }
0x1a65   :  { %2201 = dma.done.wait [#allocation4], 32  }
0x1a66   :  { %2202 = vsyncadd [#allocation4], 4294967264 }
0x1a67   :  { %1736 = vsyncpa [#allocation3], 1 }
0x1a68   :  { %1737 = vsyncpa [#allocation6], 1 }
0x1a69   :  { %1738 = vsyncpa [#allocation4], 1 }

</bundles_post_ra>
